<compile_context>
chip_gen: v5e
topology: v5e:2x2
jax: 0.10.0
libtpu: 0.0.40
codegen_flags: <defaults>
</compile_context>

<pallas_src>
import functools

import jax
import jax.numpy as jnp
from jax import lax
from jax.experimental import pallas as pl
from jax.experimental.pallas import tpu as pltpu


def _round_up(x, m):
    return (x + m - 1) // m * m


def _nbytes(a):
    return int(a.size) * a.dtype.itemsize


def _apply_act(y, act):
    if act == "relu":
        return jnp.maximum(y, 0.0)
    if act == "leaky_relu":
        return jnp.where(y >= 0.0, y, 0.01 * y)
    return y


def _has_two_tensorcores():
    """Best-effort: 2-TC (megacore) chips benefit from an N split on the tiny
    fc matmuls; single-TC chips (v5e/v6e) should not pay the extra grid step."""
    try:
        kind = jax.devices()[0].device_kind.lower()
        return any(t in kind for t in ("v7", "v4", "v3"))
    except Exception:  # pragma: no cover
        return False


FC_N_SPLIT = 2 if _has_two_tensorcores() else 1


# ---------------------------------------------------------------------------
# Kernel 1: conv as ONE merged-K matmul per batch image.
#   * Padded image is packed (free reshape) as [B, Hp/s, s, Wp/s, s*Cin] so
#     every tap (dy, dx) is a static slice -- stride never touches HBM and no
#     phase-decomposed activation copy is materialized.
#   * kh*kw tap slices are concatenated once in VMEM and hit the MXU as a
#     single large-K matmul (no per-tap VMEM accumulator traffic).
#   * Folded-BN bias + activation fused into the store epilogue.
#   * Writes exactly Ho*Wo valid rows -> no post-kernel crop.
# ---------------------------------------------------------------------------
def _conv_kernel(x_ref, w_ref, b_ref, o_ref, *, taps, Ho, Wo, Cin, act):
    parts = []
    for (qy, ry, qx, rx) in taps:
        parts.append(
            x_ref[0, qy:qy + Ho, ry, qx:qx + Wo, rx * Cin:(rx + 1) * Cin])
    patch = parts[0] if len(parts) == 1 else jnp.concatenate(parts, axis=-1)
    patch = patch.reshape(Ho * Wo, len(taps) * Cin)
    if patch.dtype != w_ref.dtype:        # bf16-weight path: feed MXU in bf16
        patch = patch.astype(w_ref.dtype)
    y = jnp.dot(patch, w_ref[...], preferred_element_type=jnp.float32)
    y = _apply_act(y + b_ref[...], act)
    o_ref[0] = y.astype(o_ref.dtype)
    # TODO(synk): for Cout=64 layers a lane-dense (Ho*Wo/2, 128) store layout
    # would avoid masked vst at half lane occupancy; skipped because the
    # required sublane->lane repack costs about what it saves at these sizes.


def conv2d(x_nhwc, w_mat, bias_row, kh, kw, stride, pad, act="none"):
    """NHWC conv; `w_mat` is the prepped [kh*kw*Cin, Cout] weight (BN folded)."""
    B, H, W, Cin = x_nhwc.shape
    Ktot, Cout = w_mat.shape
    assert Ktot == kh * kw * Cin
    s = stride
    Ho = (H + 2 * pad - kh) // s + 1
    Wo = (W + 2 * pad - kw) // s + 1
    Hp = _round_up(H + 2 * pad, s)
    Wp = _round_up(W + 2 * pad, s)
    pads = ((0, 0), (pad, Hp - H - pad), (pad, Wp - W - pad), (0, 0))
    xp = x_nhwc if all(pw == (0, 0) for pw in pads) else jnp.pad(x_nhwc, pads)
    # Contiguity-preserving (free) packing: stride handled by parity/lane slices.
    xpk = xp.reshape(B, Hp // s, s, Wp // s, s * Cin)
    taps = [(dy // s, dy % s, dx // s, dx % s)
            for dy in range(kh) for dx in range(kw)]
    flops = 2 * B * Ho * Wo * Ktot * Cout
    bytes_accessed = _nbytes(xpk) + _nbytes(w_mat) + 4 * B * Ho * Wo * Cout
    out = pl.pallas_call(
        functools.partial(_conv_kernel, taps=taps, Ho=Ho, Wo=Wo, Cin=Cin,
                          act=act),
        out_shape=jax.ShapeDtypeStruct((B, Ho * Wo, Cout), jnp.float32),
        grid=(B,),
        in_specs=[
            pl.BlockSpec((1, Hp // s, s, Wp // s, s * Cin),
                         lambda b: (b, 0, 0, 0, 0)),
            pl.BlockSpec((Ktot, Cout), lambda b: (0, 0)),
            pl.BlockSpec((1, Cout), lambda b: (0, 0)),
        ],
        out_specs=pl.BlockSpec((1, Ho * Wo, Cout), lambda b: (b, 0, 0)),
        compiler_params=pltpu.CompilerParams(
            dimension_semantics=("parallel",)),
        cost_estimate=pl.CostEstimate(flops=flops, transcendentals=0,
                                      bytes_accessed=bytes_accessed),
    )(xpk, w_mat, bias_row)
    # TODO(synk): at 224x224 scale add an Ho row-tile grid axis (and
    # vmem_limit_bytes) so per-step patch/output blocks fit v7x's 64 MiB VMEM.
    return out.reshape(B, Ho, Wo, Cout)


# ---------------------------------------------------------------------------
# Kernel 2: max-pool = running max of k*k static tap slices (same packing
# trick as the conv; no window stack, no crop).
# ---------------------------------------------------------------------------
def _maxpool_kernel(x_ref, o_ref, *, taps, Ho, Wo, C):
    acc = None
    for (qy, ry, qx, rx) in taps:
        t = x_ref[0, qy:qy + Ho, ry, qx:qx + Wo, rx * C:(rx + 1) * C]
        acc = t if acc is None else jnp.maximum(acc, t)
    o_ref[0] = acc.astype(o_ref.dtype)


def maxpool2d(x_nhwc, k, s, pad):
    B, H, W, C = x_nhwc.shape
    Ho = (H + 2 * pad - k) // s + 1
    Wo = (W + 2 * pad - k) // s + 1
    Hp = _round_up(H + 2 * pad, s)
    Wp = _round_up(W + 2 * pad, s)
    pads = ((0, 0), (pad, Hp - H - pad), (pad, Wp - W - pad), (0, 0))
    xp = (x_nhwc if all(pw == (0, 0) for pw in pads)
          else jnp.pad(x_nhwc, pads, constant_values=-jnp.inf))
    xpk = xp.reshape(B, Hp // s, s, Wp // s, s * C)
    taps = [(dy // s, dy % s, dx // s, dx % s)
            for dy in range(k) for dx in range(k)]
    flops = B * Ho * Wo * C * max(len(taps) - 1, 0)
    bytes_accessed = _nbytes(xpk) + 4 * B * Ho * Wo * C
    return pl.pallas_call(
        functools.partial(_maxpool_kernel, taps=taps, Ho=Ho, Wo=Wo, C=C),
        out_shape=jax.ShapeDtypeStruct((B, Ho, Wo, C), x_nhwc.dtype),
        grid=(B,),
        in_specs=[pl.BlockSpec((1, Hp // s, s, Wp // s, s * C),
                               lambda b: (b, 0, 0, 0, 0))],
        out_specs=pl.BlockSpec((1, Ho, Wo, C), lambda b: (b, 0, 0, 0)),
        compiler_params=pltpu.CompilerParams(
            dimension_semantics=("parallel",)),
        cost_estimate=pl.CostEstimate(flops=flops, transcendentals=0,
                                      bytes_accessed=bytes_accessed),
    )(xpk)


# ---------------------------------------------------------------------------
# Kernel 3: matmul + bias + fused activation, weights fully VMEM-resident.
# Used for the ConvTranspose and the fully-connected layers.
# ---------------------------------------------------------------------------
def _matmul_bias_act_kernel(a_ref, w_ref, b_ref, o_ref, *, act):
    lhs = a_ref[...]
    if lhs.dtype != w_ref.dtype:
        lhs = lhs.astype(w_ref.dtype)
    y = jnp.dot(lhs, w_ref[...], preferred_element_type=jnp.float32)
    o_ref[...] = _apply_act(y + b_ref[...], act).astype(o_ref.dtype)


def matmul_bias_act(a, w, bias_row, act="none", n_split=1):
    M, K = a.shape
    Kw, N = w.shape
    assert K == Kw
    tn = N // n_split if (n_split > 1 and N % n_split == 0) else N
    Mp = _round_up(M, 8)                  # pad M to the sublane only
    a_p = a if Mp == M else jnp.pad(a, ((0, Mp - M), (0, 0)))
    flops = 2 * Mp * K * N
    bytes_accessed = _nbytes(a_p) + _nbytes(w) + 4 * (Mp * N + N)
    out = pl.pallas_call(
        functools.partial(_matmul_bias_act_kernel, act=act),
        out_shape=jax.ShapeDtypeStruct((Mp, N), jnp.float32),
        grid=(N // tn,),
        in_specs=[pl.BlockSpec((Mp, K), lambda j: (0, 0)),
                  pl.BlockSpec((K, tn), lambda j: (0, j)),
                  pl.BlockSpec((1, tn), lambda j: (0, j))],
        out_specs=pl.BlockSpec((Mp, tn), lambda j: (0, j)),
        compiler_params=pltpu.CompilerParams(
            dimension_semantics=("parallel",)),
        cost_estimate=pl.CostEstimate(flops=flops, transcendentals=0,
                                      bytes_accessed=bytes_accessed),
    )(a_p, w, bias_row)
    return out[:M]


# ---------------------------------------------------------------------------
# Kernel 4: fc2 + broadcast add_tensor + concat, deduplicated: one matmul,
# the two concat halves produced in the epilogue with two different biases.
# ---------------------------------------------------------------------------
def _fc2_cat_kernel(a_ref, w_ref, ba_ref, bb_ref, o_ref):
    lhs = a_ref[...]
    if lhs.dtype != w_ref.dtype:
        lhs = lhs.astype(w_ref.dtype)
    y = jnp.dot(lhs, w_ref[...], preferred_element_type=jnp.float32)
    o_ref[...] = jnp.concatenate([y + ba_ref[...], y + bb_ref[...]],
                                 axis=1).astype(o_ref.dtype)


def fc2_cat(a, w, bias_add_row, bias_row):
    M, K = a.shape
    Kw, N = w.shape
    assert K == Kw
    Mp = _round_up(M, 8)
    a_p = a if Mp == M else jnp.pad(a, ((0, Mp - M), (0, 0)))
    flops = 2 * Mp * K * N
    bytes_accessed = _nbytes(a_p) + _nbytes(w) + 4 * (2 * Mp * N + 2 * N)
    out = pl.pallas_call(
        _fc2_cat_kernel,
        out_shape=jax.ShapeDtypeStruct((Mp, 2 * N), jnp.float32),
        grid=(1,),
        in_specs=[pl.BlockSpec((Mp, K), lambda i: (0, 0)),
                  pl.BlockSpec((K, N), lambda i: (0, 0)),
                  pl.BlockSpec((1, N), lambda i: (0, 0)),
                  pl.BlockSpec((1, N), lambda i: (0, 0))],
        out_specs=pl.BlockSpec((Mp, 2 * N), lambda i: (0, 0)),
        cost_estimate=pl.CostEstimate(flops=flops, transcendentals=0,
                                      bytes_accessed=bytes_accessed),
    )(a_p, w, bias_add_row, bias_row)
    return out[:M]


# ---------------------------------------------------------------------------
# One-time parameter preparation (outside the jitted forward).
# ---------------------------------------------------------------------------
def fold_bn(w_hwio, b, bn, eps=1e-5):
    scale = bn["g"] / jnp.sqrt(bn["v"] + eps)
    shift = bn["b"] - bn["m"] * scale
    return w_hwio * scale, b * scale + shift


def prep_params(p, weight_dtype=jnp.float32):
    """BN folding, [kh*kw*Cin,Cout] weight reshapes, ConvTranspose column
    layout, fc2+add+concat folding, optional bf16 weight cast -- done ONCE so
    none of it is re-executed on every inference."""
    def w(x):
        return x.astype(weight_dtype)

    def row(b):
        return b.reshape(1, -1).astype(jnp.float32)

    pp = {}
    pp["c1_w"] = w(p["c1_w"].reshape(3 * 3 * 3, 64));    pp["c1_b"] = row(p["c1_b"])
    w2, b2 = fold_bn(p["c2_w"], p["c2_b"], p["bn1"])
    pp["c2_w"] = w(w2.reshape(7 * 7 * 64, 64));          pp["c2_b"] = row(b2)
    pp["c3_w"] = w(p["c3_w"].reshape(3 * 3 * 64, 128));  pp["c3_b"] = row(p["c3_b"])
    w4, b4 = fold_bn(p["c4_w"], p["c4_b"], p["bn2"])
    pp["c4_w"] = w(w4.reshape(3 * 3 * 128, 128));        pp["c4_b"] = row(b4)
    pp["c5_w"] = w(p["c5_w"].reshape(128, 256));         pp["c5_b"] = row(p["c5_b"])
    w6, b6 = fold_bn(p["c6_w"], p["c6_b"], p["bn3"])
    pp["c6_w"] = w(w6.reshape(256, 256));                pp["c6_b"] = row(b6)
    # ConvTranspose2d(256,256,2,2): non-overlapping -> one matmul; columns
    # ordered (dy, dx, cout), bias tiled to match.
    pp["ct_w"] = w(p["ct_w"].reshape(256, 4 * 256))
    pp["ct_b"] = row(jnp.tile(p["ct_b"], 4))
    pp["fc1_w"] = w(p["fc1_w"]);                         pp["fc1_b"] = row(p["fc1_b"])
    # fc2 + add_tensor + concat dedup: one weight, two epilogue biases.
    pp["fc2_w"] = w(p["fc2_w"])
    pp["fc2_b_add"] = row(p["fc2_b"] + p["add_tensor"][0])
    pp["fc2_b"] = row(p["fc2_b"])
    return pp


# ---------------------------------------------------------------------------
# Parameters (deterministic synthetic init; PyTorch-style layer shapes).
# ---------------------------------------------------------------------------
def init_params(key, hw):
    kit = iter(jax.random.split(key, 32))

    def nk():
        return next(kit)

    def conv_w(kh, kw, cin, cout):
        return (jax.random.normal(nk(), (kh, kw, cin, cout), jnp.float32)
                / jnp.sqrt(float(kh * kw * cin)))

    def vec(c):
        return 0.1 * jax.random.normal(nk(), (c,), jnp.float32)

    def bn(c):
        return dict(g=1.0 + 0.1 * jax.random.normal(nk(), (c,), jnp.float32),
                    b=0.1 * jax.random.normal(nk(), (c,), jnp.float32),
                    m=0.1 * jax.random.normal(nk(), (c,), jnp.float32),
                    v=1.0 + 0.5 * jax.random.uniform(nk(), (c,), jnp.float32))

    s_final = hw // 16                    # flatten spatial size (14 for 224)
    feat = 256 * s_final * s_final

    p = {}
    p["c1_w"] = conv_w(3, 3, 3, 64);     p["c1_b"] = vec(64)
    p["c2_w"] = conv_w(7, 7, 64, 64);    p["c2_b"] = vec(64)
    p["bn1"] = bn(64)
    p["c3_w"] = conv_w(3, 3, 64, 128);   p["c3_b"] = vec(128)
    p["c4_w"] = conv_w(3, 3, 128, 128);  p["c4_b"] = vec(128)
    p["bn2"] = bn(128)
    p["c5_w"] = conv_w(1, 1, 128, 256);  p["c5_b"] = vec(256)
    p["c6_w"] = conv_w(1, 1, 256, 256);  p["c6_b"] = vec(256)
    p["bn3"] = bn(256)
    p["ct_w"] = (jax.random.normal(nk(), (256, 2, 2, 256), jnp.float32)
                 / jnp.sqrt(256.0 * 4.0))           # [Cin, kH, kW, Cout]
    p["ct_b"] = vec(256)
    p["fc1_w"] = (jax.random.normal(nk(), (feat, 1024), jnp.float32)
                  / jnp.sqrt(float(feat)))
    p["fc1_b"] = vec(1024)
    p["fc2_w"] = (jax.random.normal(nk(), (1024, 512), jnp.float32)
                  / jnp.sqrt(1024.0))
    p["fc2_b"] = vec(512)
    p["add_tensor"] = jax.random.normal(nk(), (1, 512), jnp.float32)
    # fc3 / output_tensor_constant are never used in forward() -> omitted.
    return p


# ---------------------------------------------------------------------------
# Forward pass (mirrors Net.forward, inference mode).
# ---------------------------------------------------------------------------
def net_forward(pp, x_nhwc):
    y = conv2d(x_nhwc, pp["c1_w"], pp["c1_b"], 3, 3, 1, 1)              # 32x32x64
    y = conv2d(y, pp["c2_w"], pp["c2_b"], 7, 7, 2, 3, act="relu")       # 16x16x64 (BN1+ReLU)
    y = maxpool2d(y, 2, 2, 0)                                           # 8x8x64
    y = conv2d(y, pp["c3_w"], pp["c3_b"], 3, 3, 1, 1)                   # 8x8x128
    y = conv2d(y, pp["c4_w"], pp["c4_b"], 3, 3, 2, 1, act="relu")       # 4x4x128  (BN2+ReLU)
    y = conv2d(y, pp["c5_w"], pp["c5_b"], 1, 1, 2, 0)                   # 2x2x256
    y = conv2d(y, pp["c6_w"], pp["c6_b"], 1, 1, 1, 0, act="leaky_relu") # 2x2x256  (BN3+LeakyReLU)
    y = maxpool2d(y, 3, 2, 1)                                           # 1x1x256

    # ConvTranspose2d(k=2, s=2): non-overlapping -> one matmul + interleave.
    B, H, W, Cin = y.shape
    ct = matmul_bias_act(y.reshape(B * H * W, Cin), pp["ct_w"], pp["ct_b"],
                         n_split=FC_N_SPLIT)
    Cout = ct.shape[1] // 4
    ct = ct.reshape(B, H, W, 2, 2, Cout).transpose(0, 1, 3, 2, 4, 5)
    y = ct.reshape(B, 2 * H, 2 * W, Cout)                               # 2x2x256
    # nearest-2x upsample followed by 2x2/stride-2 max-pool is the identity.

    # torch flattens NCHW -> restore channel-major order before reshape.
    flat = jnp.transpose(y, (0, 3, 1, 2)).reshape(B, -1)                # [B, 1024]
    h1 = matmul_bias_act(flat, pp["fc1_w"], pp["fc1_b"], n_split=FC_N_SPLIT)
    # Dropout (p=0.3) is the identity in eval mode.
    out_cat = fc2_cat(h1, pp["fc2_w"], pp["fc2_b_add"], pp["fc2_b"])    # [B, 1024]
    # torch's `output_sub_1 + b*h` is immediately overwritten by .flatten().
    return out_cat.reshape(-1)


# ---------------------------------------------------------------------------
# Pure-JAX reference (un-fused, mirrors the torch graph).
# ---------------------------------------------------------------------------
def reference_forward(p, x_nhwc, eps=1e-5):
    dn = ("NHWC", "HWIO", "NHWC")
    prec = lax.Precision.HIGHEST

    def conv(x, w, b, s, pad):
        return lax.conv_general_dilated(
            x, w, (s, s), ((pad, pad), (pad, pad)),
            dimension_numbers=dn, precision=prec) + b

    def bn(x, q):
        return (x - q["m"]) / jnp.sqrt(q["v"] + eps) * q["g"] + q["b"]

    def pool(x, k, s, pad):
        return lax.reduce_window(x, -jnp.inf, lax.max, (1, k, k, 1),
                                 (1, s, s, 1),
                                 ((0, 0), (pad, pad), (pad, pad), (0, 0)))

    y = conv(x_nhwc, p["c1_w"], p["c1_b"], 1, 1)
    y = jax.nn.relu(bn(conv(y, p["c2_w"], p["c2_b"], 2, 3), p["bn1"]))
    y = pool(y, 2, 2, 0)
    y = conv(y, p["c3_w"], p["c3_b"], 1, 1)
    y = jax.nn.relu(bn(conv(y, p["c4_w"], p["c4_b"], 2, 1), p["bn2"]))
    y = conv(y, p["c5_w"], p["c5_b"], 2, 0)
    y = conv(y, p["c6_w"], p["c6_b"], 1, 0)
    y = jax.nn.leaky_relu(bn(y, p["bn3"]), 0.01)
    y = pool(y, 3, 2, 1)
    B, H, W, _ = y.shape
    y = jnp.einsum("bhwc,cdeo->bhdweo", y, p["ct_w"],
                   precision=prec).reshape(B, 2 * H, 2 * W, -1) + p["ct_b"]
    y = jnp.repeat(jnp.repeat(y, 2, axis=1), 2, axis=2)  # nearest 2x upsample
    y = pool(y, 2, 2, 0)                                  # maxpool(2, stride=2)
    flat = jnp.transpose(y, (0, 3, 1, 2)).reshape(B, -1)
    h1 = jnp.dot(flat, p["fc1_w"], precision=prec) + p["fc1_b"]
    h2 = jnp.dot(h1, p["fc2_w"], precision=prec) + p["fc2_b"]
    out = jnp.concatenate([p["add_tensor"] + h2, h2], axis=1)
    return out.reshape(-1)


def _rel_err(a, b):
    return float(jnp.max(jnp.abs(a - b)) / (jnp.max(jnp.abs(b)) + 1e-6))


def _unit_checks(key):
    """Per-layer checks for the offset-error-prone paths (7x7/s2 conv and the
    strided max-pools) against lax reference ops."""
    k1, k2, k3 = jax.random.split(key, 3)
    x = jax.random.normal(k1, (2, 12, 12, 8), jnp.float32)
    w = jax.random.normal(k2, (7, 7, 8, 16), jnp.float32) / 22.0
    got = conv2d(x, w.reshape(7 * 7 * 8, 16), jnp.zeros((1, 16), jnp.float32),
                 7, 7, 2, 3)
    ref = lax.conv_general_dilated(
        x, w, (2, 2), ((3, 3), (3, 3)),
        dimension_numbers=("NHWC", "HWIO", "NHWC"),
        precision=lax.Precision.HIGHEST)
    assert _rel_err(got, ref) < 1e-2, "7x7/stride-2 conv mismatch"

    xp = jax.random.normal(k3, (2, 9, 9, 16), jnp.float32)
    got_p = maxpool2d(xp, 3, 2, 1)
    ref_p = lax.reduce_window(xp, -jnp.inf, lax.max, (1, 3, 3, 1),
                              (1, 2, 2, 1), ((0, 0), (1, 1), (1, 1), (0, 0)))
    assert _rel_err(got_p, ref_p) < 1e-5, "3x3/s2/p1 maxpool mismatch"

    xq = xp[:, :8, :8, :]
    got_q = maxpool2d(xq, 2, 2, 0)
    ref_q = lax.reduce_window(xq, -jnp.inf, lax.max, (1, 2, 2, 1),
                              (1, 2, 2, 1), ((0, 0),) * 4)
    assert _rel_err(got_q, ref_q) < 1e-5, "2x2/s2 maxpool mismatch"


if __name__ == "__main__":
    key = jax.random.PRNGKey(0)
    pkey, xkey, ckey = jax.random.split(key, 3)
    HW = 32                               # small shapes; original model is 224
    raw = init_params(pkey, HW)

    x_nchw = jax.random.normal(xkey, (2, 3, HW, HW), jnp.float32)
    x_nhwc = jnp.transpose(x_nchw, (0, 2, 3, 1))

    _unit_checks(ckey)

    # f32-weight path (verification precision).
    pp32 = prep_params(raw, jnp.float32)
    fwd = jax.jit(net_forward)
    out = fwd(pp32, x_nhwc)
    jax.block_until_ready(out)
    assert out.shape == (2 * 1024,) and out.dtype == jnp.float32
    assert bool(jnp.all(jnp.isfinite(out)))

    ref = jax.jit(reference_forward)(raw, x_nhwc)
    err32 = _rel_err(out, ref)
    assert err32 < 3e-2, f"f32 mismatch vs reference: rel err {err32}"

    # bf16-weight MXU path (v6e/v7x): halves weight DMA / VMEM residency.
    pp16 = prep_params(raw, jnp.bfloat16)
    out16 = fwd(pp16, x_nhwc)
    jax.block_until_ready(out16)
    err16 = _rel_err(out16, ref)
    assert err16 < 8e-2, f"bf16-weight mismatch vs reference: rel err {err16}"

    print("KERNEL_OK")
</pallas_src>

<mosaic_0001>
module attributes {stable_mosaic.version = 11 : i64} {
  func.func @_conv_kernel(%arg0: i32, %arg1: memref<1x9x2x9x16xf32, #tpu.memory_space<vmem>>, %arg2: memref<392x16xf32, #tpu.memory_space<vmem>>, %arg3: memref<1x16xf32, #tpu.memory_space<vmem>>, %arg4: memref<1x36x16xf32, #tpu.memory_space<vmem>>) attributes {dimension_semantics = [#tpu.dimension_semantics<parallel>], iteration_bounds = array<i64: 2>, scalar_prefetch = 0 : i64, scratch_operands = 0 : i64, tpu.core_type = #tpu.core_type<tc>, window_params = [{transform_indices = @transform_0, window_bounds = array<i64: 1, 9, 2, 9, 16>}, {pipeline_mode = #tpu.pipeline_mode<synchronous>, transform_indices = @transform_1, window_bounds = array<i64: 392, 16>}, {pipeline_mode = #tpu.pipeline_mode<synchronous>, transform_indices = @transform_2, window_bounds = array<i64: 1, 16>}, {transform_indices = @transform_3, window_bounds = array<i64: 1, 36, 16>}]} {
    %c0 = arith.constant 0 : index
    %c0_0 = arith.constant 0 : index
    %c0_1 = arith.constant 0 : index
    %c0_2 = arith.constant 0 : index
    %c0_3 = arith.constant 0 : index
    %0 = vector.load %arg1[%c0, %c0_0, %c0_1, %c0_2, %c0_3] : memref<1x9x2x9x16xf32, #tpu.memory_space<vmem>>, vector<1x6x1x6x8xf32>
    %1 = vector.shape_cast %0 : vector<1x6x1x6x8xf32> to vector<6x6x8xf32>
    %c0_4 = arith.constant 0 : index
    %c0_5 = arith.constant 0 : index
    %c0_6 = arith.constant 0 : index
    %c0_7 = arith.constant 0 : index
    %c8 = arith.constant 8 : index
    %2 = vector.load %arg1[%c0_4, %c0_5, %c0_6, %c0_7, %c8] : memref<1x9x2x9x16xf32, #tpu.memory_space<vmem>>, vector<1x6x1x6x8xf32>
    %3 = vector.shape_cast %2 : vector<1x6x1x6x8xf32> to vector<6x6x8xf32>
    %c0_8 = arith.constant 0 : index
    %c0_9 = arith.constant 0 : index
    %c0_10 = arith.constant 0 : index
    %c1 = arith.constant 1 : index
    %c0_11 = arith.constant 0 : index
    %4 = vector.load %arg1[%c0_8, %c0_9, %c0_10, %c1, %c0_11] : memref<1x9x2x9x16xf32, #tpu.memory_space<vmem>>, vector<1x6x1x6x8xf32>
    %5 = vector.shape_cast %4 : vector<1x6x1x6x8xf32> to vector<6x6x8xf32>
    %c0_12 = arith.constant 0 : index
    %c0_13 = arith.constant 0 : index
    %c0_14 = arith.constant 0 : index
    %c1_15 = arith.constant 1 : index
    %c8_16 = arith.constant 8 : index
    %6 = vector.load %arg1[%c0_12, %c0_13, %c0_14, %c1_15, %c8_16] : memref<1x9x2x9x16xf32, #tpu.memory_space<vmem>>, vector<1x6x1x6x8xf32>
    %7 = vector.shape_cast %6 : vector<1x6x1x6x8xf32> to vector<6x6x8xf32>
    %c0_17 = arith.constant 0 : index
    %c0_18 = arith.constant 0 : index
    %c0_19 = arith.constant 0 : index
    %c2 = arith.constant 2 : index
    %c0_20 = arith.constant 0 : index
    %8 = vector.load %arg1[%c0_17, %c0_18, %c0_19, %c2, %c0_20] : memref<1x9x2x9x16xf32, #tpu.memory_space<vmem>>, vector<1x6x1x6x8xf32>
    %9 = vector.shape_cast %8 : vector<1x6x1x6x8xf32> to vector<6x6x8xf32>
    %c0_21 = arith.constant 0 : index
    %c0_22 = arith.constant 0 : index
    %c0_23 = arith.constant 0 : index
    %c2_24 = arith.constant 2 : index
    %c8_25 = arith.constant 8 : index
    %10 = vector.load %arg1[%c0_21, %c0_22, %c0_23, %c2_24, %c8_25] : memref<1x9x2x9x16xf32, #tpu.memory_space<vmem>>, vector<1x6x1x6x8xf32>
    %11 = vector.shape_cast %10 : vector<1x6x1x6x8xf32> to vector<6x6x8xf32>
    %c0_26 = arith.constant 0 : index
    %c0_27 = arith.constant 0 : index
    %c0_28 = arith.constant 0 : index
    %c3 = arith.constant 3 : index
    %c0_29 = arith.constant 0 : index
    %12 = vector.load %arg1[%c0_26, %c0_27, %c0_28, %c3, %c0_29] : memref<1x9x2x9x16xf32, #tpu.memory_space<vmem>>, vector<1x6x1x6x8xf32>
    %13 = vector.shape_cast %12 : vector<1x6x1x6x8xf32> to vector<6x6x8xf32>
    %c0_30 = arith.constant 0 : index
    %c0_31 = arith.constant 0 : index
    %c1_32 = arith.constant 1 : index
    %c0_33 = arith.constant 0 : index
    %c0_34 = arith.constant 0 : index
    %14 = vector.load %arg1[%c0_30, %c0_31, %c1_32, %c0_33, %c0_34] : memref<1x9x2x9x16xf32, #tpu.memory_space<vmem>>, vector<1x6x1x6x8xf32>
    %15 = vector.shape_cast %14 : vector<1x6x1x6x8xf32> to vector<6x6x8xf32>
    %c0_35 = arith.constant 0 : index
    %c0_36 = arith.constant 0 : index
    %c1_37 = arith.constant 1 : index
    %c0_38 = arith.constant 0 : index
    %c8_39 = arith.constant 8 : index
    %16 = vector.load %arg1[%c0_35, %c0_36, %c1_37, %c0_38, %c8_39] : memref<1x9x2x9x16xf32, #tpu.memory_space<vmem>>, vector<1x6x1x6x8xf32>
    %17 = vector.shape_cast %16 : vector<1x6x1x6x8xf32> to vector<6x6x8xf32>
    %c0_40 = arith.constant 0 : index
    %c0_41 = arith.constant 0 : index
    %c1_42 = arith.constant 1 : index
    %c1_43 = arith.constant 1 : index
    %c0_44 = arith.constant 0 : index
    %18 = vector.load %arg1[%c0_40, %c0_41, %c1_42, %c1_43, %c0_44] : memref<1x9x2x9x16xf32, #tpu.memory_space<vmem>>, vector<1x6x1x6x8xf32>
    %19 = vector.shape_cast %18 : vector<1x6x1x6x8xf32> to vector<6x6x8xf32>
    %c0_45 = arith.constant 0 : index
    %c0_46 = arith.constant 0 : index
    %c1_47 = arith.constant 1 : index
    %c1_48 = arith.constant 1 : index
    %c8_49 = arith.constant 8 : index
    %20 = vector.load %arg1[%c0_45, %c0_46, %c1_47, %c1_48, %c8_49] : memref<1x9x2x9x16xf32, #tpu.memory_space<vmem>>, vector<1x6x1x6x8xf32>
    %21 = vector.shape_cast %20 : vector<1x6x1x6x8xf32> to vector<6x6x8xf32>
    %c0_50 = arith.constant 0 : index
    %c0_51 = arith.constant 0 : index
    %c1_52 = arith.constant 1 : index
    %c2_53 = arith.constant 2 : index
    %c0_54 = arith.constant 0 : index
    %22 = vector.load %arg1[%c0_50, %c0_51, %c1_52, %c2_53, %c0_54] : memref<1x9x2x9x16xf32, #tpu.memory_space<vmem>>, vector<1x6x1x6x8xf32>
    %23 = vector.shape_cast %22 : vector<1x6x1x6x8xf32> to vector<6x6x8xf32>
    %c0_55 = arith.constant 0 : index
    %c0_56 = arith.constant 0 : index
    %c1_57 = arith.constant 1 : index
    %c2_58 = arith.constant 2 : index
    %c8_59 = arith.constant 8 : index
    %24 = vector.load %arg1[%c0_55, %c0_56, %c1_57, %c2_58, %c8_59] : memref<1x9x2x9x16xf32, #tpu.memory_space<vmem>>, vector<1x6x1x6x8xf32>
    %25 = vector.shape_cast %24 : vector<1x6x1x6x8xf32> to vector<6x6x8xf32>
    %c0_60 = arith.constant 0 : index
    %c0_61 = arith.constant 0 : index
    %c1_62 = arith.constant 1 : index
    %c3_63 = arith.constant 3 : index
    %c0_64 = arith.constant 0 : index
    %26 = vector.load %arg1[%c0_60, %c0_61, %c1_62, %c3_63, %c0_64] : memref<1x9x2x9x16xf32, #tpu.memory_space<vmem>>, vector<1x6x1x6x8xf32>
    %27 = vector.shape_cast %26 : vector<1x6x1x6x8xf32> to vector<6x6x8xf32>
    %c0_65 = arith.constant 0 : index
    %c1_66 = arith.constant 1 : index
    %c0_67 = arith.constant 0 : index
    %c0_68 = arith.constant 0 : index
    %c0_69 = arith.constant 0 : index
    %28 = vector.load %arg1[%c0_65, %c1_66, %c0_67, %c0_68, %c0_69] : memref<1x9x2x9x16xf32, #tpu.memory_space<vmem>>, vector<1x6x1x6x8xf32>
    %29 = vector.shape_cast %28 : vector<1x6x1x6x8xf32> to vector<6x6x8xf32>
    %c0_70 = arith.constant 0 : index
    %c1_71 = arith.constant 1 : index
    %c0_72 = arith.constant 0 : index
    %c0_73 = arith.constant 0 : index
    %c8_74 = arith.constant 8 : index
    %30 = vector.load %arg1[%c0_70, %c1_71, %c0_72, %c0_73, %c8_74] : memref<1x9x2x9x16xf32, #tpu.memory_space<vmem>>, vector<1x6x1x6x8xf32>
    %31 = vector.shape_cast %30 : vector<1x6x1x6x8xf32> to vector<6x6x8xf32>
    %c0_75 = arith.constant 0 : index
    %c1_76 = arith.constant 1 : index
    %c0_77 = arith.constant 0 : index
    %c1_78 = arith.constant 1 : index
    %c0_79 = arith.constant 0 : index
    %32 = vector.load %arg1[%c0_75, %c1_76, %c0_77, %c1_78, %c0_79] : memref<1x9x2x9x16xf32, #tpu.memory_space<vmem>>, vector<1x6x1x6x8xf32>
    %33 = vector.shape_cast %32 : vector<1x6x1x6x8xf32> to vector<6x6x8xf32>
    %c0_80 = arith.constant 0 : index
    %c1_81 = arith.constant 1 : index
    %c0_82 = arith.constant 0 : index
    %c1_83 = arith.constant 1 : index
    %c8_84 = arith.constant 8 : index
    %34 = vector.load %arg1[%c0_80, %c1_81, %c0_82, %c1_83, %c8_84] : memref<1x9x2x9x16xf32, #tpu.memory_space<vmem>>, vector<1x6x1x6x8xf32>
    %35 = vector.shape_cast %34 : vector<1x6x1x6x8xf32> to vector<6x6x8xf32>
    %c0_85 = arith.constant 0 : index
    %c1_86 = arith.constant 1 : index
    %c0_87 = arith.constant 0 : index
    %c2_88 = arith.constant 2 : index
    %c0_89 = arith.constant 0 : index
    %36 = vector.load %arg1[%c0_85, %c1_86, %c0_87, %c2_88, %c0_89] : memref<1x9x2x9x16xf32, #tpu.memory_space<vmem>>, vector<1x6x1x6x8xf32>
    %37 = vector.shape_cast %36 : vector<1x6x1x6x8xf32> to vector<6x6x8xf32>
    %c0_90 = arith.constant 0 : index
    %c1_91 = arith.constant 1 : index
    %c0_92 = arith.constant 0 : index
    %c2_93 = arith.constant 2 : index
    %c8_94 = arith.constant 8 : index
    %38 = vector.load %arg1[%c0_90, %c1_91, %c0_92, %c2_93, %c8_94] : memref<1x9x2x9x16xf32, #tpu.memory_space<vmem>>, vector<1x6x1x6x8xf32>
    %39 = vector.shape_cast %38 : vector<1x6x1x6x8xf32> to vector<6x6x8xf32>
    %c0_95 = arith.constant 0 : index
    %c1_96 = arith.constant 1 : index
    %c0_97 = arith.constant 0 : index
    %c3_98 = arith.constant 3 : index
    %c0_99 = arith.constant 0 : index
    %40 = vector.load %arg1[%c0_95, %c1_96, %c0_97, %c3_98, %c0_99] : memref<1x9x2x9x16xf32, #tpu.memory_space<vmem>>, vector<1x6x1x6x8xf32>
    %41 = vector.shape_cast %40 : vector<1x6x1x6x8xf32> to vector<6x6x8xf32>
    %c0_100 = arith.constant 0 : index
    %c1_101 = arith.constant 1 : index
    %c1_102 = arith.constant 1 : index
    %c0_103 = arith.constant 0 : index
    %c0_104 = arith.constant 0 : index
    %42 = vector.load %arg1[%c0_100, %c1_101, %c1_102, %c0_103, %c0_104] : memref<1x9x2x9x16xf32, #tpu.memory_space<vmem>>, vector<1x6x1x6x8xf32>
    %43 = vector.shape_cast %42 : vector<1x6x1x6x8xf32> to vector<6x6x8xf32>
    %c0_105 = arith.constant 0 : index
    %c1_106 = arith.constant 1 : index
    %c1_107 = arith.constant 1 : index
    %c0_108 = arith.constant 0 : index
    %c8_109 = arith.constant 8 : index
    %44 = vector.load %arg1[%c0_105, %c1_106, %c1_107, %c0_108, %c8_109] : memref<1x9x2x9x16xf32, #tpu.memory_space<vmem>>, vector<1x6x1x6x8xf32>
    %45 = vector.shape_cast %44 : vector<1x6x1x6x8xf32> to vector<6x6x8xf32>
    %c0_110 = arith.constant 0 : index
    %c1_111 = arith.constant 1 : index
    %c1_112 = arith.constant 1 : index
    %c1_113 = arith.constant 1 : index
    %c0_114 = arith.constant 0 : index
    %46 = vector.load %arg1[%c0_110, %c1_111, %c1_112, %c1_113, %c0_114] : memref<1x9x2x9x16xf32, #tpu.memory_space<vmem>>, vector<1x6x1x6x8xf32>
    %47 = vector.shape_cast %46 : vector<1x6x1x6x8xf32> to vector<6x6x8xf32>
    %c0_115 = arith.constant 0 : index
    %c1_116 = arith.constant 1 : index
    %c1_117 = arith.constant 1 : index
    %c1_118 = arith.constant 1 : index
    %c8_119 = arith.constant 8 : index
    %48 = vector.load %arg1[%c0_115, %c1_116, %c1_117, %c1_118, %c8_119] : memref<1x9x2x9x16xf32, #tpu.memory_space<vmem>>, vector<1x6x1x6x8xf32>
    %49 = vector.shape_cast %48 : vector<1x6x1x6x8xf32> to vector<6x6x8xf32>
    %c0_120 = arith.constant 0 : index
    %c1_121 = arith.constant 1 : index
    %c1_122 = arith.constant 1 : index
    %c2_123 = arith.constant 2 : index
    %c0_124 = arith.constant 0 : index
    %50 = vector.load %arg1[%c0_120, %c1_121, %c1_122, %c2_123, %c0_124] : memref<1x9x2x9x16xf32, #tpu.memory_space<vmem>>, vector<1x6x1x6x8xf32>
    %51 = vector.shape_cast %50 : vector<1x6x1x6x8xf32> to vector<6x6x8xf32>
    %c0_125 = arith.constant 0 : index
    %c1_126 = arith.constant 1 : index
    %c1_127 = arith.constant 1 : index
    %c2_128 = arith.constant 2 : index
    %c8_129 = arith.constant 8 : index
    %52 = vector.load %arg1[%c0_125, %c1_126, %c1_127, %c2_128, %c8_129] : memref<1x9x2x9x16xf32, #tpu.memory_space<vmem>>, vector<1x6x1x6x8xf32>
    %53 = vector.shape_cast %52 : vector<1x6x1x6x8xf32> to vector<6x6x8xf32>
    %c0_130 = arith.constant 0 : index
    %c1_131 = arith.constant 1 : index
    %c1_132 = arith.constant 1 : index
    %c3_133 = arith.constant 3 : index
    %c0_134 = arith.constant 0 : index
    %54 = vector.load %arg1[%c0_130, %c1_131, %c1_132, %c3_133, %c0_134] : memref<1x9x2x9x16xf32, #tpu.memory_space<vmem>>, vector<1x6x1x6x8xf32>
    %55 = vector.shape_cast %54 : vector<1x6x1x6x8xf32> to vector<6x6x8xf32>
    %c0_135 = arith.constant 0 : index
    %c2_136 = arith.constant 2 : index
    %c0_137 = arith.constant 0 : index
    %c0_138 = arith.constant 0 : index
    %c0_139 = arith.constant 0 : index
    %56 = vector.load %arg1[%c0_135, %c2_136, %c0_137, %c0_138, %c0_139] : memref<1x9x2x9x16xf32, #tpu.memory_space<vmem>>, vector<1x6x1x6x8xf32>
    %57 = vector.shape_cast %56 : vector<1x6x1x6x8xf32> to vector<6x6x8xf32>
    %c0_140 = arith.constant 0 : index
    %c2_141 = arith.constant 2 : index
    %c0_142 = arith.constant 0 : index
    %c0_143 = arith.constant 0 : index
    %c8_144 = arith.constant 8 : index
    %58 = vector.load %arg1[%c0_140, %c2_141, %c0_142, %c0_143, %c8_144] : memref<1x9x2x9x16xf32, #tpu.memory_space<vmem>>, vector<1x6x1x6x8xf32>
    %59 = vector.shape_cast %58 : vector<1x6x1x6x8xf32> to vector<6x6x8xf32>
    %c0_145 = arith.constant 0 : index
    %c2_146 = arith.constant 2 : index
    %c0_147 = arith.constant 0 : index
    %c1_148 = arith.constant 1 : index
    %c0_149 = arith.constant 0 : index
    %60 = vector.load %arg1[%c0_145, %c2_146, %c0_147, %c1_148, %c0_149] : memref<1x9x2x9x16xf32, #tpu.memory_space<vmem>>, vector<1x6x1x6x8xf32>
    %61 = vector.shape_cast %60 : vector<1x6x1x6x8xf32> to vector<6x6x8xf32>
    %c0_150 = arith.constant 0 : index
    %c2_151 = arith.constant 2 : index
    %c0_152 = arith.constant 0 : index
    %c1_153 = arith.constant 1 : index
    %c8_154 = arith.constant 8 : index
    %62 = vector.load %arg1[%c0_150, %c2_151, %c0_152, %c1_153, %c8_154] : memref<1x9x2x9x16xf32, #tpu.memory_space<vmem>>, vector<1x6x1x6x8xf32>
    %63 = vector.shape_cast %62 : vector<1x6x1x6x8xf32> to vector<6x6x8xf32>
    %c0_155 = arith.constant 0 : index
    %c2_156 = arith.constant 2 : index
    %c0_157 = arith.constant 0 : index
    %c2_158 = arith.constant 2 : index
    %c0_159 = arith.constant 0 : index
    %64 = vector.load %arg1[%c0_155, %c2_156, %c0_157, %c2_158, %c0_159] : memref<1x9x2x9x16xf32, #tpu.memory_space<vmem>>, vector<1x6x1x6x8xf32>
    %65 = vector.shape_cast %64 : vector<1x6x1x6x8xf32> to vector<6x6x8xf32>
    %c0_160 = arith.constant 0 : index
    %c2_161 = arith.constant 2 : index
    %c0_162 = arith.constant 0 : index
    %c2_163 = arith.constant 2 : index
    %c8_164 = arith.constant 8 : index
    %66 = vector.load %arg1[%c0_160, %c2_161, %c0_162, %c2_163, %c8_164] : memref<1x9x2x9x16xf32, #tpu.memory_space<vmem>>, vector<1x6x1x6x8xf32>
    %67 = vector.shape_cast %66 : vector<1x6x1x6x8xf32> to vector<6x6x8xf32>
    %c0_165 = arith.constant 0 : index
    %c2_166 = arith.constant 2 : index
    %c0_167 = arith.constant 0 : index
    %c3_168 = arith.constant 3 : index
    %c0_169 = arith.constant 0 : index
    %68 = vector.load %arg1[%c0_165, %c2_166, %c0_167, %c3_168, %c0_169] : memref<1x9x2x9x16xf32, #tpu.memory_space<vmem>>, vector<1x6x1x6x8xf32>
    %69 = vector.shape_cast %68 : vector<1x6x1x6x8xf32> to vector<6x6x8xf32>
    %c0_170 = arith.constant 0 : index
    %c2_171 = arith.constant 2 : index
    %c1_172 = arith.constant 1 : index
    %c0_173 = arith.constant 0 : index
    %c0_174 = arith.constant 0 : index
    %70 = vector.load %arg1[%c0_170, %c2_171, %c1_172, %c0_173, %c0_174] : memref<1x9x2x9x16xf32, #tpu.memory_space<vmem>>, vector<1x6x1x6x8xf32>
    %71 = vector.shape_cast %70 : vector<1x6x1x6x8xf32> to vector<6x6x8xf32>
    %c0_175 = arith.constant 0 : index
    %c2_176 = arith.constant 2 : index
    %c1_177 = arith.constant 1 : index
    %c0_178 = arith.constant 0 : index
    %c8_179 = arith.constant 8 : index
    %72 = vector.load %arg1[%c0_175, %c2_176, %c1_177, %c0_178, %c8_179] : memref<1x9x2x9x16xf32, #tpu.memory_space<vmem>>, vector<1x6x1x6x8xf32>
    %73 = vector.shape_cast %72 : vector<1x6x1x6x8xf32> to vector<6x6x8xf32>
    %c0_180 = arith.constant 0 : index
    %c2_181 = arith.constant 2 : index
    %c1_182 = arith.constant 1 : index
    %c1_183 = arith.constant 1 : index
    %c0_184 = arith.constant 0 : index
    %74 = vector.load %arg1[%c0_180, %c2_181, %c1_182, %c1_183, %c0_184] : memref<1x9x2x9x16xf32, #tpu.memory_space<vmem>>, vector<1x6x1x6x8xf32>
    %75 = vector.shape_cast %74 : vector<1x6x1x6x8xf32> to vector<6x6x8xf32>
    %c0_185 = arith.constant 0 : index
    %c2_186 = arith.constant 2 : index
    %c1_187 = arith.constant 1 : index
    %c1_188 = arith.constant 1 : index
    %c8_189 = arith.constant 8 : index
    %76 = vector.load %arg1[%c0_185, %c2_186, %c1_187, %c1_188, %c8_189] : memref<1x9x2x9x16xf32, #tpu.memory_space<vmem>>, vector<1x6x1x6x8xf32>
    %77 = vector.shape_cast %76 : vector<1x6x1x6x8xf32> to vector<6x6x8xf32>
    %c0_190 = arith.constant 0 : index
    %c2_191 = arith.constant 2 : index
    %c1_192 = arith.constant 1 : index
    %c2_193 = arith.constant 2 : index
    %c0_194 = arith.constant 0 : index
    %78 = vector.load %arg1[%c0_190, %c2_191, %c1_192, %c2_193, %c0_194] : memref<1x9x2x9x16xf32, #tpu.memory_space<vmem>>, vector<1x6x1x6x8xf32>
    %79 = vector.shape_cast %78 : vector<1x6x1x6x8xf32> to vector<6x6x8xf32>
    %c0_195 = arith.constant 0 : index
    %c2_196 = arith.constant 2 : index
    %c1_197 = arith.constant 1 : index
    %c2_198 = arith.constant 2 : index
    %c8_199 = arith.constant 8 : index
    %80 = vector.load %arg1[%c0_195, %c2_196, %c1_197, %c2_198, %c8_199] : memref<1x9x2x9x16xf32, #tpu.memory_space<vmem>>, vector<1x6x1x6x8xf32>
    %81 = vector.shape_cast %80 : vector<1x6x1x6x8xf32> to vector<6x6x8xf32>
    %c0_200 = arith.constant 0 : index
    %c2_201 = arith.constant 2 : index
    %c1_202 = arith.constant 1 : index
    %c3_203 = arith.constant 3 : index
    %c0_204 = arith.constant 0 : index
    %82 = vector.load %arg1[%c0_200, %c2_201, %c1_202, %c3_203, %c0_204] : memref<1x9x2x9x16xf32, #tpu.memory_space<vmem>>, vector<1x6x1x6x8xf32>
    %83 = vector.shape_cast %82 : vector<1x6x1x6x8xf32> to vector<6x6x8xf32>
    %c0_205 = arith.constant 0 : index
    %c3_206 = arith.constant 3 : index
    %c0_207 = arith.constant 0 : index
    %c0_208 = arith.constant 0 : index
    %c0_209 = arith.constant 0 : index
    %84 = vector.load %arg1[%c0_205, %c3_206, %c0_207, %c0_208, %c0_209] : memref<1x9x2x9x16xf32, #tpu.memory_space<vmem>>, vector<1x6x1x6x8xf32>
    %85 = vector.shape_cast %84 : vector<1x6x1x6x8xf32> to vector<6x6x8xf32>
    %c0_210 = arith.constant 0 : index
    %c3_211 = arith.constant 3 : index
    %c0_212 = arith.constant 0 : index
    %c0_213 = arith.constant 0 : index
    %c8_214 = arith.constant 8 : index
    %86 = vector.load %arg1[%c0_210, %c3_211, %c0_212, %c0_213, %c8_214] : memref<1x9x2x9x16xf32, #tpu.memory_space<vmem>>, vector<1x6x1x6x8xf32>
    %87 = vector.shape_cast %86 : vector<1x6x1x6x8xf32> to vector<6x6x8xf32>
    %c0_215 = arith.constant 0 : index
    %c3_216 = arith.constant 3 : index
    %c0_217 = arith.constant 0 : index
    %c1_218 = arith.constant 1 : index
    %c0_219 = arith.constant 0 : index
    %88 = vector.load %arg1[%c0_215, %c3_216, %c0_217, %c1_218, %c0_219] : memref<1x9x2x9x16xf32, #tpu.memory_space<vmem>>, vector<1x6x1x6x8xf32>
    %89 = vector.shape_cast %88 : vector<1x6x1x6x8xf32> to vector<6x6x8xf32>
    %c0_220 = arith.constant 0 : index
    %c3_221 = arith.constant 3 : index
    %c0_222 = arith.constant 0 : index
    %c1_223 = arith.constant 1 : index
    %c8_224 = arith.constant 8 : index
    %90 = vector.load %arg1[%c0_220, %c3_221, %c0_222, %c1_223, %c8_224] : memref<1x9x2x9x16xf32, #tpu.memory_space<vmem>>, vector<1x6x1x6x8xf32>
    %91 = vector.shape_cast %90 : vector<1x6x1x6x8xf32> to vector<6x6x8xf32>
    %c0_225 = arith.constant 0 : index
    %c3_226 = arith.constant 3 : index
    %c0_227 = arith.constant 0 : index
    %c2_228 = arith.constant 2 : index
    %c0_229 = arith.constant 0 : index
    %92 = vector.load %arg1[%c0_225, %c3_226, %c0_227, %c2_228, %c0_229] : memref<1x9x2x9x16xf32, #tpu.memory_space<vmem>>, vector<1x6x1x6x8xf32>
    %93 = vector.shape_cast %92 : vector<1x6x1x6x8xf32> to vector<6x6x8xf32>
    %c0_230 = arith.constant 0 : index
    %c3_231 = arith.constant 3 : index
    %c0_232 = arith.constant 0 : index
    %c2_233 = arith.constant 2 : index
    %c8_234 = arith.constant 8 : index
    %94 = vector.load %arg1[%c0_230, %c3_231, %c0_232, %c2_233, %c8_234] : memref<1x9x2x9x16xf32, #tpu.memory_space<vmem>>, vector<1x6x1x6x8xf32>
    %95 = vector.shape_cast %94 : vector<1x6x1x6x8xf32> to vector<6x6x8xf32>
    %c0_235 = arith.constant 0 : index
    %c3_236 = arith.constant 3 : index
    %c0_237 = arith.constant 0 : index
    %c3_238 = arith.constant 3 : index
    %c0_239 = arith.constant 0 : index
    %96 = vector.load %arg1[%c0_235, %c3_236, %c0_237, %c3_238, %c0_239] : memref<1x9x2x9x16xf32, #tpu.memory_space<vmem>>, vector<1x6x1x6x8xf32>
    %97 = vector.shape_cast %96 : vector<1x6x1x6x8xf32> to vector<6x6x8xf32>
    %98 = tpu.concatenate %1, %3, %5, %7, %9, %11, %13, %15, %17, %19, %21, %23, %25, %27, %29, %31 in 2 : vector<6x6x8xf32>, vector<6x6x8xf32>, vector<6x6x8xf32>, vector<6x6x8xf32>, vector<6x6x8xf32>, vector<6x6x8xf32>, vector<6x6x8xf32>, vector<6x6x8xf32>, vector<6x6x8xf32>, vector<6x6x8xf32>, vector<6x6x8xf32>, vector<6x6x8xf32>, vector<6x6x8xf32>, vector<6x6x8xf32>, vector<6x6x8xf32>, vector<6x6x8xf32> -> vector<6x6x128xf32>
    %99 = tpu.concatenate %33, %35, %37, %39, %41, %43, %45, %47, %49, %51, %53, %55, %57, %59, %61, %63 in 2 : vector<6x6x8xf32>, vector<6x6x8xf32>, vector<6x6x8xf32>, vector<6x6x8xf32>, vector<6x6x8xf32>, vector<6x6x8xf32>, vector<6x6x8xf32>, vector<6x6x8xf32>, vector<6x6x8xf32>, vector<6x6x8xf32>, vector<6x6x8xf32>, vector<6x6x8xf32>, vector<6x6x8xf32>, vector<6x6x8xf32>, vector<6x6x8xf32>, vector<6x6x8xf32> -> vector<6x6x128xf32>
    %100 = tpu.concatenate %65, %67, %69, %71, %73, %75, %77, %79, %81, %83, %85, %87, %89, %91, %93, %95 in 2 : vector<6x6x8xf32>, vector<6x6x8xf32>, vector<6x6x8xf32>, vector<6x6x8xf32>, vector<6x6x8xf32>, vector<6x6x8xf32>, vector<6x6x8xf32>, vector<6x6x8xf32>, vector<6x6x8xf32>, vector<6x6x8xf32>, vector<6x6x8xf32>, vector<6x6x8xf32>, vector<6x6x8xf32>, vector<6x6x8xf32>, vector<6x6x8xf32>, vector<6x6x8xf32> -> vector<6x6x128xf32>
    %101 = tpu.concatenate %98, %99, %100, %97 in 2 : vector<6x6x128xf32>, vector<6x6x128xf32>, vector<6x6x128xf32>, vector<6x6x8xf32> -> vector<6x6x392xf32>
    %102 = vector.shape_cast %101 : vector<6x6x392xf32> to vector<36x392xf32>
    %c0_240 = arith.constant 0 : index
    %c0_241 = arith.constant 0 : index
    %103 = vector.load %arg2[%c0_240, %c0_241] : memref<392x16xf32, #tpu.memory_space<vmem>>, vector<392x16xf32>
    %cst = arith.constant dense<0.000000e+00> : vector<36x16xf32>
    %104 = tpu.matmul %102, %103, %cst {dimension_numbers = #tpu.dot_dimension_numbers<[1], [0], [0], [1], [0, 0, 1, 1], [], []>} : vector<36x392xf32>, vector<392x16xf32>, vector<36x16xf32> -> vector<36x16xf32>
    %c0_242 = arith.constant 0 : index
    %c0_243 = arith.constant 0 : index
    %105 = vector.load %arg3[%c0_242, %c0_243] : memref<1x16xf32, #tpu.memory_space<vmem>>, vector<1x16xf32>
    %106 = vector.broadcast %105 : vector<1x16xf32> to vector<36x16xf32>
    %107 = arith.addf %104, %106 : vector<36x16xf32>
    %c0_244 = arith.constant 0 : index
    %c0_245 = arith.constant 0 : index
    %c0_246 = arith.constant 0 : index
    %108 = vector.load %arg4[%c0_244, %c0_245, %c0_246] : memref<1x36x16xf32, #tpu.memory_space<vmem>>, vector<1x36x16xf32>
    %109 = vector.shape_cast %108 : vector<1x36x16xf32> to vector<36x16xf32>
    %110 = vector.shape_cast %107 : vector<36x16xf32> to vector<1x36x16xf32>
    tpu.vector_store %arg4[%c0_244, %c0_245, %c0_246], %110 {strides = array<i32>} : memref<1x36x16xf32, #tpu.memory_space<vmem>>, vector<1x36x16xf32>,
    return
  }
  func.func @transform_0(%arg0: i32) -> (i32, i32, i32, i32, i32) {
    %c0_i32 = arith.constant 0 : i32
    %c0_i32_0 = arith.constant 0 : i32
    %c0_i32_1 = arith.constant 0 : i32
    %c0_i32_2 = arith.constant 0 : i32
    %c0_i32_3 = arith.constant 0 : i32
    return %arg0, %c0_i32, %c0_i32_0, %c0_i32_1, %c0_i32_2 : i32, i32, i32, i32, i32
  }
  func.func @transform_1(%arg0: i32) -> (i32, i32) {
    %c0_i32 = arith.constant 0 : i32
    %c0_i32_0 = arith.constant 0 : i32
    %c0_i32_1 = arith.constant 0 : i32
    return %c0_i32, %c0_i32_0 : i32, i32
  }
  func.func @transform_2(%arg0: i32) -> (i32, i32) {
    %c0_i32 = arith.constant 0 : i32
    %c0_i32_0 = arith.constant 0 : i32
    %c0_i32_1 = arith.constant 0 : i32
    return %c0_i32, %c0_i32_0 : i32, i32
  }
  func.func @transform_3(%arg0: i32) -> (i32, i32, i32) {
    %c0_i32 = arith.constant 0 : i32
    %c0_i32_0 = arith.constant 0 : i32
    %c0_i32_1 = arith.constant 0 : i32
    return %arg0, %c0_i32, %c0_i32_0 : i32, i32, i32
  }
}

</mosaic_0001>

<bundles_post_ra>
// kernel: tpu_custom_call.1
= control target key start
LH: loop header
LB: loop body
LE: loop exit
PB: predicated region body
PF: predicated region fallthrough
CT: control target
= control target key end

     0   :  { %s1835_s12 = smov 0   ;;  %s2811_s0 = inlined_call_operand.vmem [shape: f32[2,9,2,9,16], index: 0, kind: input, shape index: {}]   ;;  %s2812_s1 = inlined_call_operand.vmem [shape: f32[392,16], index: 1, kind: input, shape index: {}]   ;;  %s2813_s2 = inlined_call_operand.vmem [shape: f32[1,16], index: 2, kind: input, shape index: {}]   ;;  %s2814_s3 = inlined_call_operand.vmem [shape: f32[2,36,16], index: 3, kind: output, shape index: {}]  }
   0x1 LB: > { %s1614_s13 = sadd.s32 4294967295, %s1801_s12   ;;  %p1618_p0 = scmp.ge.s32.totalorder %s1801_s12, 1  ;;  %s1801_s12 = sphi %s1835_s12, %s13_s12  }
   0x2   : > { %p137_p1 = scmp.lt.s32.totalorder %s1801_s12, 3 }
   0x4   : > { %p138_p2 = pnand %p1618_p0, %p137_p1 }
   0x5   : > { %p161_p3 = scmp.lt.s32.totalorder (!%p138_p2), %s1614_s13, 1  ;;  %s1803_s18 = smov (!%p138_p2), 16  }
   0x6   : > { %141 = sbr.rel (%p138_p2) target bundleno = 673 (0x2a1), region = 32  ;;  %s1804_s19 = smov (!%p138_p2), 32  }
   0x7   : > { %s1805_s20 = smov (!%p138_p2), 48   ;;  %s1806_s21 = smov (!%p138_p2), 56  }
   0x8   : > { %s1807_s22 = smov (!%p138_p2), 72   ;;  %s1808_s23 = smov (!%p138_p2), 88  }
   0x9   : > { %s1809_s24 = smov (!%p138_p2), 104   ;;  %s1810_s25 = smov (!%p138_p2), 112  }
   0xa   : > { %s1811_s26 = smov (!%p138_p2), 40   ;;  %s1812_s27 = smov (!%p138_p2), 24  }
   0xb   : > { %s2882_s13 = smov (!%p161_p3, %s1614_s13), 1  ;;  %vm2819_vm0 = vcmask 130048   ;;  %vm2820_vm1 = vcmask 195584   ;;  %vm2821_vm2 = vcmask 261120   ;;  %vm2818_vm3 = vcmask 326656   ;;  %s1813_s28 = smov 80  }
   0xc   : > { %s1772_s14 = smul.u32 288, %s2882_s13  ;;  %vm2817_vm4 = vcmask 392192   ;;  %vm573_vm5 = vcmask 457728   ;;  %vm580_vm6 = vcmask 523264   ;;  %vm587_vm7 = vcmask 588800   ;;  %s1814_s29 = smov 96  }
   0xd   : > { %vm594_vm8 = vcmask 654336   ;;  %vm601_vm9 = vcmask 719872   ;;  %vm2815_vm10 = vcmask 785408   ;;  %vm2816_vm11 = vcmask 850944  }
   0xe   : > { %s1849_s17 = scalar_lea.vmem %s2811_s0, %s1772_s14  ;;  %vm622_vm12 = vcmask 916480   ;;  %vm629_vm13 = vcmask 982016   ;;  %vm2822_vm14 = vcmask 1043458   ;;  %vm1230_vm15 = vcmask 1041408  }
   0xf   : > { %v181_v0 = vld [vmem:[%s1849_s17 + $0x81] sm:$0x3f]  ;;  %v1623_v18 = vld [vmem:[%s1849_s17 + $0x50] sm:$0x3f] }
  0x10   : > { %v179_v1 = vld [vmem:[%s1849_s17 + $0x41] sm:$0x3f]  ;;  %359 = vrot.lane.b32.xlu2 %v181_v0, %s1803_s18  ;;  %v1622_v19 = vld [vmem:[%s1849_s17 + $0x30] sm:$0x3f] }
  0x11   : > { %v177_v2 = vld [vmem:[%s1849_s17 + $0x1] sm:$0x3f]  ;;  %355 = vrot.lane.b32.xlu1 %v179_v1, %s1803_s18  ;;  %v1621_v20 = vld [vmem:[%s1849_s17 + $0x10] sm:$0x3f] }
  0x12   : > { %351 = vrot.lane.b32.xlu0 %v177_v2, %s1803_s18  ;;  %v182_v3 = vld [vmem:[%s1849_s17 + $0xa1] sm:$0x3f]  ;;  %v1626_v21 = vld [vmem:[%s1849_s17 + $0xb0] sm:$0x3f] }
  0x13   : > { %v180_v4 = vld [vmem:[%s1849_s17 + $0x61] sm:$0x3f]  ;;  %v1625_v22 = vld [vmem:[%s1849_s17 + $0x90] sm:$0x3f] }
  0x14   : > { %v178_v5 = vld [vmem:[%s1849_s17 + $0x21] sm:$0x3f]  ;;  %v1624_v23 = vld [vmem:[%s1849_s17 + $0x70] sm:$0x3f] }
  0x15   : > { %v185_v6 = vld [vmem:[%s1849_s17 + $0x42] sm:$0x3f]  ;;  %v1629_v24 = vld [vmem:[%s1849_s17 + $0x51] sm:$0x3f] }
  0x16   : > { %v184_v7 = vld [vmem:[%s1849_s17 + $0x22] sm:$0x3f]  ;;  %v1628_v25 = vld [vmem:[%s1849_s17 + $0x31] sm:$0x3f] }
  0x17   : > { %v183_v8 = vld [vmem:[%s1849_s17 + $0x2] sm:$0x3f]  ;;  %v1627_v26 = vld [vmem:[%s1849_s17 + $0x11] sm:$0x3f] }
  0x18   : > { %361 = vrot.lane.b32.xlu2 %v182_v3, %s1803_s18  ;;  %v188_v9 = vld [vmem:[%s1849_s17 + $0xa2] sm:$0x3f]  ;;  %v1632_v27 = vld [vmem:[%s1849_s17 + $0xb1] sm:$0x3f] }
  0x19   : > { %357 = vrot.lane.b32.xlu1 %v180_v4, %s1803_s18  ;;  %v187_v10 = vld [vmem:[%s1849_s17 + $0x82] sm:$0x3f]  ;;  %v1631_v28 = vld [vmem:[%s1849_s17 + $0x91] sm:$0x3f] }
  0x1a   : > { %353 = vrot.lane.b32.xlu0 %v178_v5, %s1803_s18  ;;  %v186_v11 = vld [vmem:[%s1849_s17 + $0x62] sm:$0x3f]  ;;  %v1630_v29 = vld [vmem:[%s1849_s17 + $0x71] sm:$0x3f] }
  0x1b   : > { %v191_v12 = vld [vmem:[%s1849_s17 + $0x43] sm:$0x3f]  ;;  %v1635_v30 = vld [vmem:[%s1849_s17 + $0x52] sm:$0x3f] }
  0x1c   : > { %v190_v13 = vld [vmem:[%s1849_s17 + $0x23] sm:$0x3f]  ;;  %v1634_v31 = vld [vmem:[%s1849_s17 + $0x32] sm:$0x3f] }
  0x1d   : > { %v189_v14 = vld [vmem:[%s1849_s17 + $0x3] sm:$0x3f]  ;;  %v1633_v32 = vld [vmem:[%s1849_s17 + $0x12] sm:$0x3f] }
  0x1e   : > { %v194_v15 = vld [vmem:[%s1849_s17 + $0xa3] sm:$0x3f]  ;;  %v1638_v33 = vld [vmem:[%s1849_s17 + $0xb2] sm:$0x3f] }
  0x1f   : > { %v193_v16 = vld [vmem:[%s1849_s17 + $0x83] sm:$0x3f]  ;;  %v1637_v34 = vld [vmem:[%s1849_s17 + $0x92] sm:$0x3f] }
  0x20   : > { %379 = vrot.lane.b32.xlu2 %v185_v6, %s1804_s19  ;;  %v192_v17 = vld [vmem:[%s1849_s17 + $0x63] sm:$0x3f]  ;;  %v1636_v35 = vld [vmem:[%s1849_s17 + $0x72] sm:$0x3f] }
  0x21   : > { %377 = vrot.lane.b32.xlu1 %v184_v7, %s1804_s19  ;;  %v1641_v37 = vld [vmem:[%s1849_s17 + $0x53] sm:$0x3f]  ;;  %v176_v44 = vld [vmem:[%s1849_s17 + $0xa0] sm:$0x3f] }
  0x22   : > { %375 = vrot.lane.b32.xlu0 %v183_v8, %s1804_s19  ;;  %v1640_v38 = vld [vmem:[%s1849_s17 + $0x33] sm:$0x3f]  ;;  %v1647_v47 = vld [vmem:[%s1849_s17 + $0x60] sm:$0x3f] }
  0x23   : > { %v1639_v39 = vld [vmem:[%s1849_s17 + $0x13] sm:$0x3f]  ;;  %v1646_v48 = vld [vmem:[%s1849_s17 + $0x40] sm:$0x3f] }
  0x24   : > { %v1644_v41 = vld [vmem:[%s1849_s17 + $0xb3] sm:$0x3f]  ;;  %v1645_v49 = vld [vmem:[%s1849_s17 + $0x20] sm:$0x3f] }
  0x25   : > { %v1643_v42 = vld [vmem:[%s1849_s17 + $0x93] sm:$0x3f]  ;;  %v173_v51 = vld [vmem:[%s1849_s17 + $0x40] sm:$0x3f] }
  0x26   : > { %v1642_v43 = vld [vmem:[%s1849_s17 + $0x73] sm:$0x3f]  ;;  %v1650_v60 = vld [vmem:[%s1849_s17 + $0xc0] sm:$0x3f] }
  0x27   : > { %v1649_v61 = vld [vmem:[%s1849_s17 + $0xa0] sm:$0x3f] }
  0x28   : > { %385 = vrot.lane.b32.xlu2 %v188_v9, %s1804_s19  ;;  %v1648_v62 = vld [vmem:[%s1849_s17 + $0x80] sm:$0x3f] }
  0x29   : > { %383 = vrot.lane.b32.xlu1 %v187_v10, %s1804_s19  ;;  %v172_v4 = vld [vmem:[%s1849_s17 + $0x20] sm:$0x3f] }
  0x2a   : > { %381 = vrot.lane.b32.xlu0 %v186_v11, %s1804_s19  ;;  %v171_v5 = vld [vmem:[%s1849_s17] sm:$0x3f] }
  0x2b   : > { %v1659_v6 = vld [vmem:[%s1849_s17 + $0x62] sm:$0x3f] }
  0x2c   : > { %v1658_v7 = vld [vmem:[%s1849_s17 + $0x42] sm:$0x3f] }
  0x2d   : > { %v1657_v8 = vld [vmem:[%s1849_s17 + $0x22] sm:$0x3f] }
  0x30   : > { %403 = vrot.lane.b32.xlu2 %v191_v12, %s1805_s20 }
  0x31   : > { %401 = vrot.lane.b32.xlu1 %v190_v13, %s1805_s20 }
  0x32   : > { %399 = vrot.lane.b32.xlu0 %v189_v14, %s1805_s20 }
  0x38   : > { %409 = vrot.lane.b32.xlu2 %v194_v15, %s1805_s20 }
  0x39   : > { %407 = vrot.lane.b32.xlu1 %v193_v16, %s1805_s20 }
  0x3a   : > { %405 = vrot.lane.b32.xlu0 %v192_v17, %s1805_s20 }
  0x40   : > { %427 = vrot.lane.b32.xlu2 %v1623_v18, %s1806_s21  ;;  %v175_v18 = vld [vmem:[%s1849_s17 + $0x80] sm:$0x3f] }
  0x41   : > { %425 = vrot.lane.b32.xlu1 %v1622_v19, %s1806_s21 }
  0x42   : > { %423 = vrot.lane.b32.xlu0 %v1621_v20, %s1806_s21 }
  0x48   : > { %433 = vrot.lane.b32.xlu2 %v1626_v21, %s1806_s21  ;;  %v174_v21 = vld [vmem:[%s1849_s17 + $0x60] sm:$0x3f] }
  0x49   : > { %431 = vrot.lane.b32.xlu1 %v1625_v22, %s1806_s21 }
  0x4a   : > { %429 = vrot.lane.b32.xlu0 %v1624_v23, %s1806_s21  ;;  %v1662_v23 = vld [vmem:[%s1849_s17 + $0xc2] sm:$0x3f] }
  0x50   : > { %451 = vrot.lane.b32.xlu2 %v1629_v24, %s1807_s22  ;;  %v1661_v24 = vld [vmem:[%s1849_s17 + $0xa2] sm:$0x3f] }
  0x51   : > { %449 = vrot.lane.b32.xlu1 %v1628_v25, %s1807_s22  ;;  %v1660_v25 = vld [vmem:[%s1849_s17 + $0x82] sm:$0x3f] }
  0x52   : > { %447 = vrot.lane.b32.xlu0 %v1627_v26, %s1807_s22 }
  0x58   : > { %457 = vrot.lane.b32.xlu2 %v1632_v27, %s1807_s22 }
  0x59   : > { %455 = vrot.lane.b32.xlu1 %v1631_v28, %s1807_s22 }
  0x5a   : > { %453 = vrot.lane.b32.xlu0 %v1630_v29, %s1807_s22 }
  0x60   : > { %475 = vrot.lane.b32.xlu2 %v1635_v30, %s1808_s23 }
  0x61   : > { %473 = vrot.lane.b32.xlu1 %v1634_v31, %s1808_s23 }
  0x62   : > { %471 = vrot.lane.b32.xlu0 %v1633_v32, %s1808_s23 }
  0x68   : > { %481 = vrot.lane.b32.xlu2 %v1638_v33, %s1808_s23 }
  0x69   : > { %479 = vrot.lane.b32.xlu1 %v1637_v34, %s1808_s23 }
  0x6a   : > { %477 = vrot.lane.b32.xlu0 %v1636_v35, %s1808_s23  ;;  %v1917_v36 = vpop.permute.xlu2 %359 }
  0x6b   : > { %v543_v26 = vsel %vm2819_vm0, %v175_v18, %v1917_v36 }
  0x6c   : > { %v550_v28 = vsel %vm2820_vm1, %v543_v26, %v1917_v36  ;;  %v1665_v36 = vld [vmem:[%s1849_s17 + $0x63] sm:$0x3f] }
  0x70   : > { %499 = vrot.lane.b32.xlu2 %v1641_v37, %s1809_s24 }
  0x71   : > { %497 = vrot.lane.b32.xlu1 %v1640_v38, %s1809_s24 }
  0x72   : > { %495 = vrot.lane.b32.xlu0 %v1639_v39, %s1809_s24  ;;  %v362_v40 = vpop.permute.xlu2 %361 }
  0x73   : > { %v544_v46 = vsel %vm2819_vm0, %v176_v44, %v362_v40 }
  0x74   : > { %v551_v50 = vsel %vm2820_vm1, %v544_v46, %v362_v40  ;;  %v1664_v40 = vld [vmem:[%s1849_s17 + $0x43] sm:$0x3f] }
  0x78   : > { %505 = vrot.lane.b32.xlu2 %v1644_v41, %s1809_s24  ;;  %v1663_v41 = vld [vmem:[%s1849_s17 + $0x23] sm:$0x3f] }
  0x79   : > { %503 = vrot.lane.b32.xlu1 %v1643_v42, %s1809_s24 }
  0x7a   : > { %501 = vrot.lane.b32.xlu0 %v1642_v43, %s1809_s24  ;;  %v380_v45 = vpop.permute.xlu2 %379 }
  0x80   : > { %523 = vrot.lane.b32.xlu2 %v1647_v47, %s1810_s25 }
  0x81   : > { %521 = vrot.lane.b32.xlu1 %v1646_v48, %s1810_s25 }
  0x82   : > { %519 = vrot.lane.b32.xlu0 %v1645_v49, %s1810_s25  ;;  %v386_v52 = vpop.permute.xlu2 %385  ;;  %v1668_v49 = vld [vmem:[%s1849_s17 + $0xc3] sm:$0x3f] }
  0x83   : > { %v356_v53 = vpop.permute.xlu1 %355  ;;  %v558_v54 = vsel %vm2821_vm2, %v551_v50, %v386_v52  ;;  %v1667_v50 = vld [vmem:[%s1849_s17 + $0xa3] sm:$0x3f] }
  0x84   : > { %v541_v55 = vsel %vm2819_vm0, %v173_v51, %v356_v53  ;;  %v352_v56 = vpop.permute.xlu0 %351  ;;  %v565_v57 = vsel %vm2818_vm3, %v558_v54, %v386_v52  ;;  %v1666_v51 = vld [vmem:[%s1849_s17 + $0x83] sm:$0x3f] }
  0x85   : > { %v548_v58 = vsel %vm2820_vm1, %v541_v55, %v356_v53  ;;  %v539_v10 = vsel %vm2819_vm0, %v171_v5, %v352_v56 }
  0x86   : > { %v555_v59 = vsel %vm2821_vm2, %v548_v58, %v380_v45  ;;  %v546_v14 = vsel %vm2820_vm1, %v539_v10, %v352_v56 }
  0x87   : > { %v562_v63 = vsel %vm2818_vm3, %v555_v59, %v380_v45  ;;  %v1671_v59 = vld [vmem:[%s1849_s17 + $0x70] sm:$0x3f] }
  0x88   : > { %529 = vrot.lane.b32.xlu2 %v1650_v60, %s1810_s25  ;;  %v1670_v60 = vld [vmem:[%s1849_s17 + $0x50] sm:$0x3f] }
  0x89   : > { %527 = vrot.lane.b32.xlu1 %v1649_v61, %s1810_s25  ;;  %v1669_v61 = vld [vmem:[%s1849_s17 + $0x30] sm:$0x3f] }
  0x8a   : > { %525 = vrot.lane.b32.xlu0 %v1648_v62, %s1810_s25  ;;  %v404_v0 = vpop.permute.xlu2 %403 }
  0x8b   : > { %v358_v1 = vpop.permute.xlu1 %357  ;;  %v569_v2 = vsel %vm2817_vm4, %v562_v63, %v404_v0 }
  0x8c   : > { %v354_v3 = vpop.permute.xlu0 %353  ;;  %v542_v27 = vsel %vm2819_vm0, %v174_v21, %v358_v1  ;;  %v1711_v21 = vld [vmem:[%s1849_s17 + $0x43] sm:$0x3f] }
  0x8d   : > { %v540_v9 = vsel %vm2819_vm0, %v172_v4, %v354_v3  ;;  %v549_v31 = vsel %vm2820_vm1, %v542_v27, %v358_v1 }
  0x8e   : > { %v547_v11 = vsel %vm2820_vm1, %v540_v9, %v354_v3  ;;  %v1672_v9 = vld [vmem:[%s1849_s17 + $0x90] sm:$0x3f] }
  0x90   : > { %646 = vrot.lane.b32.xlu2 %v1659_v6, %s1803_s18 }
  0x91   : > { %644 = vrot.lane.b32.xlu1 %v1658_v7, %s1803_s18  ;;  %v1674_v7 = vld [vmem:[%s1849_s17 + $0xd0] sm:$0x3f] }
  0x92   : > { %642 = vrot.lane.b32.xlu0 %v1657_v8, %s1803_s18  ;;  %v410_v12 = vpop.permute.xlu2 %409  ;;  %v1673_v8 = vld [vmem:[%s1849_s17 + $0xb0] sm:$0x3f] }
  0x93   : > { %v378_v13 = vpop.permute.xlu1 %377  ;;  %v572_v15 = vsel %vm2817_vm4, %v565_v57, %v410_v12 }
  0x94   : > { %v554_v16 = vsel %vm2821_vm2, %v547_v11, %v378_v13  ;;  %v376_v17 = vpop.permute.xlu0 %375 }
  0x95   : > { %v561_v19 = vsel %vm2818_vm3, %v554_v16, %v378_v13  ;;  %v553_v20 = vsel %vm2821_vm2, %v546_v14, %v376_v17 }
  0x96   : > { %v560_v22 = vsel %vm2818_vm3, %v553_v20, %v376_v17  ;;  %v1717_v20 = vld [vmem:[%s1849_s17 + $0x50] sm:$0x3f] }
  0x98   : > { %652 = vrot.lane.b32.xlu2 %v1662_v23, %s1803_s18 }
  0x99   : > { %650 = vrot.lane.b32.xlu1 %v1661_v24, %s1803_s18 }
  0x9a   : > { %648 = vrot.lane.b32.xlu0 %v1660_v25, %s1803_s18  ;;  %v428_v29 = vpop.permute.xlu2 %427 }
  0x9b   : > { %v384_v30 = vpop.permute.xlu1 %383  ;;  %v576_v32 = vsel %vm573_vm5, %v569_v2, %v428_v29 }
  0x9c   : > { %v557_v33 = vsel %vm2821_vm2, %v550_v28, %v384_v30  ;;  %v382_v34 = vpop.permute.xlu0 %381  ;;  %v583_v35 = vsel %vm580_vm6, %v576_v32, %v428_v29  ;;  %v1723_v32 = vld [vmem:[%s1849_s17 + $0x51] sm:$0x3f] }
  0x9d   : > { %v564_v37 = vsel %vm2818_vm3, %v557_v33, %v384_v30  ;;  %v556_v38 = vsel %vm2821_vm2, %v549_v31, %v382_v34  ;;  %v1675_v31 = vld [vmem:[%s1849_s17 + $0x31] sm:$0x3f] }
  0x9e   : > { %v563_v39 = vsel %vm2818_vm3, %v556_v38, %v382_v34  ;;  %v1718_v33 = vld [vmem:[%s1849_s17 + $0x70] sm:$0x3f] }
  0xa0   : > { %670 = vrot.lane.b32.xlu2 %v1665_v36, %s1804_s19 }
  0xa1   : > { %668 = vrot.lane.b32.xlu1 %v1664_v40, %s1804_s19 }
  0xa2   : > { %666 = vrot.lane.b32.xlu0 %v1663_v41, %s1804_s19  ;;  %v434_v42 = vpop.permute.xlu2 %433 }
  0xa3   : > { %v402_v43 = vpop.permute.xlu1 %401  ;;  %v579_v44 = vsel %vm573_vm5, %v572_v15, %v434_v42 }
  0xa4   : > { %v568_v45 = vsel %vm2817_vm4, %v561_v19, %v402_v43  ;;  %v400_v46 = vpop.permute.xlu0 %399  ;;  %v586_v47 = vsel %vm580_vm6, %v579_v44, %v434_v42  ;;  %v1712_v19 = vld [vmem:[%s1849_s17 + $0x63] sm:$0x3f]  ;;  %v1676_v42 = vld [vmem:[%s1849_s17 + $0x51] sm:$0x3f] }
  0xa5   : > { %v567_v48 = vsel %vm2817_vm4, %v560_v22, %v400_v46  ;;  %v1729_v43 = vld [vmem:[%s1849_s17 + $0x52] sm:$0x3f] }
  0xa6   : > { %v1724_v44 = vld [vmem:[%s1849_s17 + $0x71] sm:$0x3f] }
  0xa8   : > { %676 = vrot.lane.b32.xlu2 %v1668_v49, %s1804_s19 }
  0xa9   : > { %674 = vrot.lane.b32.xlu1 %v1667_v50, %s1804_s19 }
  0xaa   : > { %672 = vrot.lane.b32.xlu0 %v1666_v51, %s1804_s19  ;;  %v452_v52 = vpop.permute.xlu2 %451 }
  0xab   : > { %v408_v53 = vpop.permute.xlu1 %407  ;;  %v590_v54 = vsel %vm587_vm7, %v583_v35, %v452_v52 }
  0xac   : > { %v571_v55 = vsel %vm2817_vm4, %v564_v37, %v408_v53  ;;  %v406_v56 = vpop.permute.xlu0 %405  ;;  %v597_v57 = vsel %vm594_vm8, %v590_v54, %v452_v52  ;;  %v1735_v53 = vld [vmem:[%s1849_s17 + $0x53] sm:$0x3f] }
  0xad   : > { %v570_v58 = vsel %vm2817_vm4, %v563_v39, %v406_v56  ;;  %v1730_v54 = vld [vmem:[%s1849_s17 + $0x72] sm:$0x3f] }
  0xb0   : > { %694 = vrot.lane.b32.xlu2 %v1671_v59, %s1811_s26 }
  0xb1   : > { %692 = vrot.lane.b32.xlu1 %v1670_v60, %s1811_s26 }
  0xb2   : > { %690 = vrot.lane.b32.xlu0 %v1669_v61, %s1811_s26  ;;  %v458_v62 = vpop.permute.xlu2 %457 }
  0xb3   : > { %v426_v63 = vpop.permute.xlu1 %425  ;;  %v593_v0 = vsel %vm587_vm7, %v586_v47, %v458_v62 }
  0xb4   : > { %v575_v1 = vsel %vm573_vm5, %v568_v45, %v426_v63  ;;  %v424_v2 = vpop.permute.xlu0 %423  ;;  %v600_v3 = vsel %vm594_vm8, %v593_v0, %v458_v62 }
  0xb5   : > { %v582_v4 = vsel %vm580_vm6, %v575_v1, %v426_v63  ;;  %v574_v5 = vsel %vm573_vm5, %v567_v48, %v424_v2  ;;  %v1682_v1 = vld [vmem:[%s1849_s17 + $0x52] sm:$0x3f] }
  0xb6   : > { %v581_v6 = vsel %vm580_vm6, %v574_v5, %v424_v2  ;;  %v1741_v2 = vld [vmem:[%s1849_s17 + $0x60] sm:$0x3f] }
  0xb8   : > { %700 = vrot.lane.b32.xlu2 %v1674_v7, %s1811_s26 }
  0xb9   : > { %698 = vrot.lane.b32.xlu1 %v1673_v8, %s1811_s26 }
  0xba   : > { %696 = vrot.lane.b32.xlu0 %v1672_v9, %s1811_s26  ;;  %v476_v10 = vpop.permute.xlu2 %475 }
  0xbb   : > { %v432_v11 = vpop.permute.xlu1 %431  ;;  %v604_v12 = vsel %vm601_vm9, %v597_v57, %v476_v10 }
  0xbc   : > { %v578_v13 = vsel %vm573_vm5, %v571_v55, %v432_v11  ;;  %v430_v14 = vpop.permute.xlu0 %429  ;;  %v611_v15 = vsel %vm2815_vm10, %v604_v12, %v476_v10  ;;  %v1681_v55 = vld [vmem:[%s1849_s17 + $0x32] sm:$0x3f] }
  0xbd   : > { %v585_v16 = vsel %vm580_vm6, %v578_v13, %v432_v11  ;;  %v577_v17 = vsel %vm573_vm5, %v570_v58, %v430_v14  ;;  %v1736_v11 = vld [vmem:[%s1849_s17 + $0x73] sm:$0x3f] }
  0xbe   : > { %v584_v18 = vsel %vm580_vm6, %v577_v17, %v430_v14  ;;  %v1719_v12 = vld [vmem:[%s1849_s17 + $0x90] sm:$0x3f] }
  0xbf   : > { %v1687_v13 = vld [vmem:[%s1849_s17 + $0x33] sm:$0x3f] }
  0xc0   : > { %920 = vrot.lane.b32.xlu2 %v1712_v19, %s1803_s18  ;;  %v1747_v19 = vld [vmem:[%s1849_s17 + $0x61] sm:$0x3f] }
  0xc1   : > { %942 = vrot.lane.b32.xlu1 %v1717_v20, %s1812_s27  ;;  %v1742_v20 = vld [vmem:[%s1849_s17 + $0x80] sm:$0x3f] }
  0xc2   : > { %918 = vrot.lane.b32.xlu0 %v1711_v21, %s1803_s18  ;;  %v482_v22 = vpop.permute.xlu2 %481  ;;  %v1693_v21 = vld [vmem:[%s1849_s17 + $0x40] sm:$0x3f] }
  0xc3   : > { %v450_v23 = vpop.permute.xlu1 %449  ;;  %v607_v24 = vsel %vm601_vm9, %v600_v3, %v482_v22  ;;  %v1713_v3 = vld [vmem:[%s1849_s17 + $0x83] sm:$0x3f] }
  0xc4   : > { %v589_v25 = vsel %vm587_vm7, %v582_v4, %v450_v23  ;;  %v448_v26 = vpop.permute.xlu0 %447  ;;  %v614_v27 = vsel %vm2815_vm10, %v607_v24, %v482_v22  ;;  %v1653_v22 = vld [vmem:[%s1849_s17 + $0x61] sm:$0x3f] }
  0xc5   : > { %v596_v28 = vsel %vm594_vm8, %v589_v25, %v450_v23  ;;  %v588_v29 = vsel %vm587_vm7, %v581_v6, %v448_v26 }
  0xc6   : > { %v595_v30 = vsel %vm594_vm8, %v588_v29, %v448_v26 }
  0xc8   : > { %714 = vrot.lane.b32.xlu2 %v1675_v31, %s1806_s21  ;;  %v1694_v31 = vld [vmem:[%s1849_s17 + $0x60] sm:$0x3f] }
  0xc9   : > { %966 = vrot.lane.b32.xlu1 %v1723_v32, %s1811_s26  ;;  %v1725_v32 = vld [vmem:[%s1849_s17 + $0x91] sm:$0x3f] }
  0xca   : > { %944 = vrot.lane.b32.xlu0 %v1718_v33, %s1812_s27  ;;  %v500_v34 = vpop.permute.xlu2 %499  ;;  %v1688_v33 = vld [vmem:[%s1849_s17 + $0x53] sm:$0x3f] }
  0xcb   : > { %v456_v35 = vpop.permute.xlu1 %455  ;;  %v618_v37 = vsel %vm2816_vm11, %v611_v15, %v500_v34 }
  0xcc   : > { %v592_v38 = vsel %vm587_vm7, %v585_v16, %v456_v35  ;;  %v454_v39 = vpop.permute.xlu0 %453 }
  0xcd   : > { %v599_v36 = vsel %vm594_vm8, %v592_v38, %v456_v35  ;;  %v591_v40 = vsel %vm587_vm7, %v584_v18, %v454_v39  ;;  %v1656_v35 = vld [vmem:[%s1849_s17 + $0xc1] sm:$0x3f] }
  0xce   : > { %v598_v41 = vsel %vm594_vm8, %v591_v40, %v454_v39 }
  0xd0   : > { %716 = vrot.lane.b32.xlu2 %v1676_v42, %s1806_s21 }
  0xd1   : > { %990 = vrot.lane.b32.xlu1 %v1729_v43, %s1806_s21 }
  0xd2   : > { %968 = vrot.lane.b32.xlu0 %v1724_v44, %s1811_s26  ;;  %v506_v45 = vpop.permute.xlu2 %505 }
  0xd3   : > { %v474_v46 = vpop.permute.xlu1 %473  ;;  %v621_v47 = vsel %vm2816_vm11, %v614_v27, %v506_v45  ;;  %v1753_v45 = vld [vmem:[%s1849_s17 + $0x62] sm:$0x3f] }
  0xd4   : > { %v603_v48 = vsel %vm601_vm9, %v596_v28, %v474_v46  ;;  %v472_v49 = vpop.permute.xlu0 %471 }
  0xd5   : > { %v610_v50 = vsel %vm2815_vm10, %v603_v48, %v474_v46  ;;  %v602_v51 = vsel %vm601_vm9, %v595_v30, %v472_v49  ;;  %v1748_v46 = vld [vmem:[%s1849_s17 + $0x81] sm:$0x3f] }
  0xd6   : > { %v609_v52 = vsel %vm2815_vm10, %v602_v51, %v472_v49 }
  0xd8   : > { %1014 = vrot.lane.b32.xlu2 %v1735_v53, %s1807_s22  ;;  %v1731_v53 = vld [vmem:[%s1849_s17 + $0x92] sm:$0x3f] }
  0xd9   : > { %992 = vrot.lane.b32.xlu1 %v1730_v54, %s1806_s21  ;;  %v1700_v54 = vld [vmem:[%s1849_s17 + $0x61] sm:$0x3f] }
  0xda   : > { %738 = vrot.lane.b32.xlu0 %v1681_v55, %s1807_s22  ;;  %v524_v56 = vpop.permute.xlu2 %523  ;;  %v1677_v55 = vld [vmem:[%s1849_s17 + $0x71] sm:$0x3f] }
  0xdb   : > { %v480_v57 = vpop.permute.xlu1 %479  ;;  %v625_v58 = vsel %vm622_vm12, %v618_v37, %v524_v56 }
  0xdc   : > { %v606_v59 = vsel %vm601_vm9, %v599_v36, %v480_v57  ;;  %v478_v60 = vpop.permute.xlu0 %477  ;;  %v2072_v61 = vsel %vm629_vm13, %v625_v58, %v524_v56 }
  0xdd   : > { %v613_v62 = vsel %vm2815_vm10, %v606_v59, %v480_v57  ;;  %v605_v63 = vsel %vm601_vm9, %v598_v41, %v478_v60 }
  0xde   : > { %v612_v0 = vsel %vm2815_vm10, %v605_v63, %v478_v60  ;;  %v1652_v60 = vld [vmem:[%s1849_s17 + $0x41] sm:$0x3f] }
  0xdf   : > { %v1651_v63 = vld [vmem:[%s1849_s17 + $0x21] sm:$0x3f] }
  0xe0   : > { %740 = vrot.lane.b32.xlu2 %v1682_v1, %s1807_s22  ;;  %v1737_v1 = vld [vmem:[%s1849_s17 + $0x93] sm:$0x3f] }
  0xe1   : > { %1038 = vrot.lane.b32.xlu1 %v1741_v2, %s1813_s28  ;;  %v1754_v2 = vld [vmem:[%s1849_s17 + $0x82] sm:$0x3f] }
  0xe2   : > { %922 = vrot.lane.b32.xlu0 %v1713_v3, %s1803_s18  ;;  %v530_v4 = vpop.permute.xlu2 %529 }
  0xe3   : > { %v498_v5 = vpop.permute.xlu1 %497  ;;  %v628_v6 = vsel %vm622_vm12, %v621_v47, %v530_v4  ;;  %v1699_v47 = vld [vmem:[%s1849_s17 + $0x41] sm:$0x3f] }
  0xe4   : > { %v617_v7 = vsel %vm2816_vm11, %v610_v50, %v498_v5  ;;  %v496_v8 = vpop.permute.xlu0 %495  ;;  %v2086_v9 = vsel %vm629_vm13, %v628_v6, %v530_v4 }
  0xe5   : > { %v616_v10 = vsel %vm2816_vm11, %v609_v52, %v496_v8 }
  0xe8   : > { %1016 = vrot.lane.b32.xlu2 %v1736_v11, %s1807_s22 }
  0xe9   : > { %946 = vrot.lane.b32.xlu1 %v1719_v12, %s1812_s27 }
  0xea   : > { %762 = vrot.lane.b32.xlu0 %v1687_v13, %s1808_s23  ;;  %v647_v14 = vpop.permute.xlu2 %646  ;;  %v1655_v13 = vld [vmem:[%s1849_s17 + $0xa1] sm:$0x3f] }
  0xeb   : > { %v504_v15 = vpop.permute.xlu1 %503  ;;  %v830_v29 = vsel %vm2819_vm0, %v1653_v22, %v647_v14 }
  0xec   : > { %v620_v16 = vsel %vm2816_vm11, %v613_v62, %v504_v15  ;;  %v502_v17 = vpop.permute.xlu0 %501  ;;  %v836_v34 = vsel %vm2820_vm1, %v830_v29, %v647_v14 }
  0xed   : > { %v619_v18 = vsel %vm2816_vm11, %v612_v0, %v502_v17  ;;  %v1683_v0 = vld [vmem:[%s1849_s17 + $0x72] sm:$0x3f]  ;;  %v1743_v17 = vld [vmem:[%s1849_s17 + $0xa0] sm:$0x3f] }
  0xf0   : > { %1062 = vrot.lane.b32.xlu2 %v1747_v19, %s1814_s29  ;;  %v1714_v19 = vld [vmem:[%s1849_s17 + $0xa3] sm:$0x3f] }
  0xf1   : > { %1040 = vrot.lane.b32.xlu1 %v1742_v20, %s1813_s28 }
  0xf2   : > { %786 = vrot.lane.b32.xlu0 %v1693_v21, %s1814_s29  ;;  %v653_v23 = vpop.permute.xlu2 %652 }
  0xf3   : > { %v522_v24 = vpop.permute.xlu1 %521  ;;  %v833_v43 = vsel %vm2819_vm0, %v1656_v35, %v653_v23 }
  0xf4   : > { %v624_v25 = vsel %vm622_vm12, %v617_v7, %v522_v24  ;;  %v520_v26 = vpop.permute.xlu0 %519  ;;  %v839_v48 = vsel %vm2820_vm1, %v833_v43, %v653_v23  ;;  %v1755_v43 = vld [vmem:[%s1849_s17 + $0xa2] sm:$0x3f] }
  0xf5   : > { %v2106_v27 = vsel %vm629_vm13, %v624_v25, %v522_v24  ;;  %v623_v28 = vsel %vm622_vm12, %v616_v10, %v520_v26 }
  0xf6   : > { %v2111_v30 = vsel %vm629_vm13, %v623_v28, %v520_v26 }
  0xf8   : > { %788 = vrot.lane.b32.xlu2 %v1694_v31, %s1814_s29  ;;  %v1695_v31 = vld [vmem:[%s1849_s17 + $0x80] sm:$0x3f] }
  0xf9   : > { %970 = vrot.lane.b32.xlu1 %v1725_v32, %s1811_s26  ;;  %v1749_v32 = vld [vmem:[%s1849_s17 + $0xa1] sm:$0x3f] }
  0xfa   : > { %764 = vrot.lane.b32.xlu0 %v1688_v33, %s1808_s23  ;;  %v671_v37 = vpop.permute.xlu2 %670  ;;  %v1720_v33 = vld [vmem:[%s1849_s17 + $0xb0] sm:$0x3f] }
  0xfb   : > { %v528_v38 = vpop.permute.xlu1 %527  ;;  %v842_v39 = vsel %vm2821_vm2, %v836_v34, %v671_v37 }
  0xfc   : > { %v627_v36 = vsel %vm622_vm12, %v620_v16, %v528_v38  ;;  %v526_v40 = vpop.permute.xlu0 %525  ;;  %v1654_v16 = vld [vmem:[%s1849_s17 + $0x81] sm:$0x3f] }
  0xfd   : > { %v2124_v41 = vsel %vm629_vm13, %v627_v36, %v528_v38  ;;  %v626_v42 = vsel %vm622_vm12, %v619_v18, %v526_v40  ;;  %v1689_v18 = vld [vmem:[%s1849_s17 + $0x73] sm:$0x3f] }
  0xfe   : > { %v2129_v44 = vsel %vm629_vm13, %v626_v42, %v526_v40  ;;  %v1701_v42 = vld [vmem:[%s1849_s17 + $0x81] sm:$0x3f] }
 0x100   : > { %1086 = vrot.lane.b32.xlu2 %v1753_v45, %s1810_s25  ;;  %v1726_v45 = vld [vmem:[%s1849_s17 + $0xb1] sm:$0x3f] }
 0x101   : > { %1064 = vrot.lane.b32.xlu1 %v1748_v46, %s1814_s29 }
 0x102   : > { %810 = vrot.lane.b32.xlu0 %v1699_v47, %s1810_s25  ;;  %v677_v49 = vpop.permute.xlu2 %676 }
 0x103   : > { %v645_v50 = vpop.permute.xlu1 %644  ;;  %v845_v51 = vsel %vm2821_vm2, %v839_v48, %v677_v49 }
 0x104   : > { %v643_v52 = vpop.permute.xlu0 %642  ;;  %v829_v3 = vsel %vm2819_vm0, %v1652_v60, %v645_v50  ;;  %v1744_v60 = vld [vmem:[%s1849_s17 + $0xc0] sm:$0x3f] }
 0x105   : > { %v828_v4 = vsel %vm2819_vm0, %v1651_v63, %v643_v52  ;;  %v835_v5 = vsel %vm2820_vm1, %v829_v3, %v645_v50  ;;  %v1738_v63 = vld [vmem:[%s1849_s17 + $0xb3] sm:$0x3f] }
 0x106   : > { %v834_v8 = vsel %vm2820_vm1, %v828_v4, %v643_v52  ;;  %v1721_v3 = vld [vmem:[%s1849_s17 + $0xd0] sm:$0x3f]  ;;  %v1696_v4 = vld [vmem:[%s1849_s17 + $0xa0] sm:$0x3f] }
 0x108   : > { %812 = vrot.lane.b32.xlu2 %v1700_v54, %s1810_s25  ;;  %v1684_v54 = vld [vmem:[%s1849_s17 + $0x92] sm:$0x3f] }
 0x109   : > { %994 = vrot.lane.b32.xlu1 %v1731_v53, %s1806_s21  ;;  %v1732_v53 = vld [vmem:[%s1849_s17 + $0xb2] sm:$0x3f] }
 0x10a   : > { %718 = vrot.lane.b32.xlu0 %v1677_v55, %s1806_s21  ;;  %v695_v56 = vpop.permute.xlu2 %694  ;;  %v1678_v55 = vld [vmem:[%s1849_s17 + $0x91] sm:$0x3f] }
 0x10b   : > { %v651_v57 = vpop.permute.xlu1 %650  ;;  %v848_v58 = vsel %vm2818_vm3, %v842_v39, %v695_v56 }
 0x10c   : > { %v649_v59 = vpop.permute.xlu0 %648  ;;  %v2148_v62 = vsel %vm2817_vm4, %v848_v58, %v695_v56  ;;  %v832_v20 = vsel %vm2819_vm0, %v1655_v13, %v651_v57 }
 0x10d   : > { %v831_v21 = vsel %vm2819_vm0, %v1654_v16, %v649_v59  ;;  %v838_v22 = vsel %vm2820_vm1, %v832_v20, %v651_v57  ;;  %v1727_v20 = vld [vmem:[%s1849_s17 + $0xd1] sm:$0x3f] }
 0x10e   : > { %v837_v25 = vsel %vm2820_vm1, %v831_v21, %v649_v59  ;;  %v1715_v59 = vld [vmem:[%s1849_s17 + $0xc3] sm:$0x3f] }
 0x110   : > { %1018 = vrot.lane.b32.xlu2 %v1737_v1, %s1807_s22 }
 0x111   : > { %742 = vrot.lane.b32.xlu1 %v1683_v0, %s1807_s22 }
 0x112   : > { %1088 = vrot.lane.b32.xlu0 %v1754_v2, %s1810_s25  ;;  %v701_v6 = vpop.permute.xlu2 %700 }
 0x113   : > { %v669_v7 = vpop.permute.xlu1 %668  ;;  %v851_v10 = vsel %vm2818_vm3, %v845_v51, %v701_v6 }
 0x114   : > { %v841_v11 = vsel %vm2821_vm2, %v835_v5, %v669_v7  ;;  %v667_v12 = vpop.permute.xlu0 %666  ;;  %v2165_v14 = vsel %vm2817_vm4, %v851_v10, %v701_v6  ;;  %v1690_v5 = vld [vmem:[%s1849_s17 + $0x93] sm:$0x3f]  ;;  %v1750_v10 = vld [vmem:[%s1849_s17 + $0xc1] sm:$0x3f] }
 0x115   : > { %v840_v15 = vsel %vm2821_vm2, %v834_v8, %v667_v12  ;;  %v1716_v12 = vld [vmem:[%s1849_s17 + $0xe3] sm:$0x3f] }
 0x118   : > { %766 = vrot.lane.b32.xlu2 %v1689_v18, %s1808_s23  ;;  %v1702_v18 = vld [vmem:[%s1849_s17 + $0xa1] sm:$0x3f] }
 0x119   : > { %1042 = vrot.lane.b32.xlu1 %v1743_v17, %s1813_s28  ;;  %v1705_v17 = vld [vmem:[%s1849_s17 + $0x42] sm:$0x3f] }
 0x11a   : > { %924 = vrot.lane.b32.xlu0 %v1714_v19, %s1803_s18  ;;  %v2178_v23 = vpop.permute.xlu2 %920  ;;  %v1756_v19 = vld [vmem:[%s1849_s17 + $0xc2] sm:$0x3f] }
 0x11b   : > { %v675_v24 = vpop.permute.xlu1 %674 }
 0x11c   : > { %v844_v26 = vsel %vm2821_vm2, %v838_v22, %v675_v24  ;;  %v673_v28 = vpop.permute.xlu0 %672  ;;  %v1317_v22 = vld [vmem:[%s2812_s1 + $0x78] sm:$0xff] }
 0x11d   : > { %v843_v29 = vsel %vm2821_vm2, %v837_v25, %v673_v28  ;;  %v1333_v24 = vld [vmem:[%s2812_s1 + $0xf8] sm:$0xff]  ;;  %1425 = vmatpush.msra.mxu0 %v1317_v22 }
 0x11e   : > { %v1349_v25 = vld [vmem:[%s2812_s1 + $0x178] sm:$0xff]  ;;  %1457 = vmatpush.msra.mxu1 %v1333_v24 }
 0x11f   : > { %1489 = vmatpush.msra.mxu2 %v1349_v25 }
 0x120   : > { %1066 = vrot.lane.b32.xlu2 %v1749_v32, %s1814_s29  ;;  %v1728_v32 = vld [vmem:[%s1849_s17 + $0xf1] sm:$0x3f] }
 0x121   : > { %790 = vrot.lane.b32.xlu1 %v1695_v31, %s1814_s29 }
 0x122   : > { %948 = vrot.lane.b32.xlu0 %v1720_v33, %s1812_s27  ;;  %v2189_v34 = vpop.permute.xlu2 %714  ;;  %v1733_v33 = vld [vmem:[%s1849_s17 + $0xd2] sm:$0x3f] }
 0x123   : > { %v693_v35 = vpop.permute.xlu1 %692 }
 0x124   : > { %v847_v37 = vsel %vm2818_vm3, %v841_v11, %v693_v35  ;;  %v691_v38 = vpop.permute.xlu0 %690  ;;  %v1722_v11 = vld [vmem:[%s1849_s17 + $0xf0] sm:$0x3f] }
 0x125   : > { %v2193_v39 = vsel %vm2817_vm4, %v847_v37, %v693_v35  ;;  %v846_v36 = vsel %vm2818_vm3, %v840_v15, %v691_v38  ;;  %v1316_v35 = vld [vmem:[%s2812_s1 + $0x70] sm:$0xff] }
 0x126   : > { %v2197_v40 = vsel %vm2817_vm4, %v846_v36, %v691_v38  ;;  %v1332_v37 = vld [vmem:[%s2812_s1 + $0xf0] sm:$0xff]  ;;  %1426 = vmatpush.msra.mxu0 %v1316_v35 }
 0x127   : > { %v1348_v38 = vld [vmem:[%s2812_s1 + $0x170] sm:$0xff]  ;;  %1458 = vmatpush.msra.mxu1 %v1332_v37  ;;  %v1325_v37 = vld [vmem:[%s2812_s1 + $0xb8] sm:$0xff] }
 0x128   : > { %1090 = vrot.lane.b32.xlu2 %v1755_v43, %s1810_s25  ;;  %1490 = vmatpush.msra.mxu2 %v1348_v38 }
 0x129   : > { %814 = vrot.lane.b32.xlu1 %v1701_v42, %s1810_s25  ;;  %v1679_v42 = vld [vmem:[%s1849_s17 + $0xb1] sm:$0x3f] }
 0x12a   : > { %972 = vrot.lane.b32.xlu0 %v1726_v45, %s1811_s26  ;;  %v2205_v46 = vpop.permute.xlu2 %716  ;;  %v1315_v45 = vld [vmem:[%s2812_s1 + $0x68] sm:$0xff] }
 0x12b   : > { %v699_v47 = vpop.permute.xlu1 %698  ;;  %1427 = vmatpush.msra.mxu0 %v1315_v45  ;;  %v859_v35 = vsel %vm573_vm5, %v2193_v39, %v2205_v46  ;;  %v1341_v45 = vld [vmem:[%s2812_s1 + $0x138] sm:$0xff]  ;;  %v1706_v39 = vld [vmem:[%s1849_s17 + $0x62] sm:$0x3f] }
 0x12c   : > { %v850_v48 = vsel %vm2818_vm3, %v844_v26, %v699_v47  ;;  %v697_v49 = vpop.permute.xlu0 %696 }
 0x12d   : > { %v2209_v50 = vsel %vm2817_vm4, %v850_v48, %v699_v47  ;;  %v849_v51 = vsel %vm2818_vm3, %v843_v29, %v697_v49  ;;  %v1331_v47 = vld [vmem:[%s2812_s1 + $0xe8] sm:$0xff] }
 0x12e   : > { %v2213_v52 = vsel %vm2817_vm4, %v849_v51, %v697_v49  ;;  %v1347_v48 = vld [vmem:[%s2812_s1 + $0x168] sm:$0xff]  ;;  %v1314_v49 = vld [vmem:[%s2812_s1 + $0x60] sm:$0xff]  ;;  %1459 = vmatpush.msra.mxu1 %v1331_v47  ;;  %v858_v47 = vsel %vm573_vm5, %v2197_v40, %v2189_v34  ;;  %v1340_v40 = vld [vmem:[%s2812_s1 + $0x130] sm:$0xff] }
 0x12f   : > { %v1330_v51 = vld [vmem:[%s2812_s1 + $0xe0] sm:$0xff]  ;;  %1491 = vmatpush.msra.mxu2 %v1347_v48  ;;  %1428 = vmatpush.msra.mxu0 %v1314_v49  ;;  %v865_v48 = vsel %vm580_vm6, %v859_v35, %v2205_v46  ;;  %v1324_v49 = vld [vmem:[%s2812_s1 + $0xb0] sm:$0xff]  ;;  %v1307_v46 = vld [vmem:[%s2812_s1 + $0x28] sm:$0xff] }
 0x130   : > { %744 = vrot.lane.b32.xlu2 %v1684_v54, %s1807_s22  ;;  %1460 = vmatpush.msra.mxu1 %v1330_v51  ;;  %v1759_v35 = vld [vmem:[%s1849_s17 + $0x63] sm:$0x3f] }
 0x131   : > { %996 = vrot.lane.b32.xlu1 %v1732_v53, %s1806_s21  ;;  %v1346_v53 = vld [vmem:[%s2812_s1 + $0x160] sm:$0xff] }
 0x132   : > { %720 = vrot.lane.b32.xlu0 %v1678_v55, %s1806_s21  ;;  %v2221_v56 = vpop.permute.xlu2 %1014  ;;  %1492 = vmatpush.msra.mxu2 %v1346_v53 }
 0x133   : > { %v943_v57 = vpop.permute.xlu1 %942 }
 0x134   : > { %v919_v58 = vpop.permute.xlu0 %918 }
 0x135   : > { %v1104_v21 = vsel %vm2819_vm0, %v1705_v17, %v919_v58  ;;  %v1344_v17 = vld [vmem:[%s2812_s1 + $0x150] sm:$0xff] }
 0x136   : > { %v1110_v29 = vsel %vm2820_vm1, %v1104_v21, %v943_v57  ;;  %v1310_v21 = vld [vmem:[%s2812_s1 + $0x40] sm:$0xff] }
 0x137   : > { %v1116_v36 = vsel %vm2821_vm2, %v1110_v29, %v943_v57 }
 0x138   : > { %1044 = vrot.lane.b32.xlu2 %v1744_v60, %s1813_s28  ;;  %v1313_v60 = vld [vmem:[%s2812_s1 + $0x58] sm:$0xff] }
 0x139   : > { %926 = vrot.lane.b32.xlu1 %v1715_v59, %s1803_s18  ;;  %1429 = vmatpush.msra.mxu0 %v1313_v60  ;;  %v864_v60 = vsel %vm580_vm6, %v858_v47, %v2189_v34 }
 0x13a   : > { %1020 = vrot.lane.b32.xlu0 %v1738_v63, %s1807_s22  ;;  %v2229_v0 = vpop.permute.xlu2 %740  ;;  %v1329_v63 = vld [vmem:[%s2812_s1 + $0xd8] sm:$0xff] }
 0x13b   : > { %v967_v1 = vpop.permute.xlu1 %966  ;;  %1461 = vmatpush.msra.mxu1 %v1329_v63  ;;  %v871_v51 = vsel %vm587_vm7, %v865_v48, %v2229_v0 }
 0x13c   : > { %v2231_v2 = vpop.permute.xlu0 %944  ;;  %v1122_v43 = vsel %vm2818_vm3, %v1116_v36, %v967_v1  ;;  %v1745_v36 = vld [vmem:[%s1849_s17 + $0xe0] sm:$0x3f] }
 0x13d   : > { %v1128_v54 = vsel %vm2817_vm4, %v1122_v43, %v967_v1  ;;  %v1345_v1 = vld [vmem:[%s2812_s1 + $0x158] sm:$0xff] }
 0x13e   : > { %1493 = vmatpush.msra.mxu2 %v1345_v1  ;;  %v1739_v43 = vld [vmem:[%s1849_s17 + $0xd3] sm:$0x3f] }
 0x140   : > { %792 = vrot.lane.b32.xlu2 %v1696_v4, %s1814_s29  ;;  %v1734_v4 = vld [vmem:[%s1849_s17 + $0xf2] sm:$0x3f]  ;;  %1494 = vmatpush.msra.mxu2 %v1344_v17 }
 0x141   : > { %950 = vrot.lane.b32.xlu1 %v1721_v3, %s1812_s27  ;;  %v1685_v3 = vld [vmem:[%s1849_s17 + $0xb2] sm:$0x3f] }
 0x142   : > { %768 = vrot.lane.b32.xlu0 %v1690_v5, %s1808_s23  ;;  %v2239_v6 = vpop.permute.xlu2 %1016  ;;  %v1312_v5 = vld [vmem:[%s2812_s1 + $0x50] sm:$0xff] }
 0x143   : > { %v2241_v7 = vpop.permute.xlu1 %990  ;;  %1430 = vmatpush.msra.mxu0 %v1312_v5 }
 0x144   : > { %v2243_v8 = vpop.permute.xlu0 %968  ;;  %v1134_v58 = vsel %vm573_vm5, %v1128_v54, %v2241_v7  ;;  %v1323_v54 = vld [vmem:[%s2812_s1 + $0xa8] sm:$0xff] }
 0x148   : > { %952 = vrot.lane.b32.xlu2 %v1722_v11, %s1812_s27  ;;  %v1680_v11 = vld [vmem:[%s1849_s17 + $0xd1] sm:$0x3f] }
 0x149   : > { %1068 = vrot.lane.b32.xlu1 %v1750_v10, %s1814_s29  ;;  %v1140_v10 = vsel %vm580_vm6, %v1134_v58, %v2241_v7  ;;  %v1327_v7 = vld [vmem:[%s2812_s1 + $0xc8] sm:$0xff]  ;;  %v1105_v58 = vsel %vm2819_vm0, %v1706_v39, %v2178_v23  ;;  %v1214_v39 = vrot.slane %v1759_v35, 2 }
 0x14a   : > { %928 = vrot.lane.b32.xlu0 %v1716_v12, %s1803_s18  ;;  %v2251_v13 = vpop.permute.xlu2 %1062  ;;  %v1328_v12 = vld [vmem:[%s2812_s1 + $0xd0] sm:$0xff]  ;;  %v1111_v23 = vsel %vm2820_vm1, %v1105_v58, %v2231_v2  ;;  %v1319_v58 = vld [vmem:[%s2812_s1 + $0x88] sm:$0xff] }
 0x14b   : > { %v2253_v15 = vpop.permute.xlu1 %992  ;;  %1462 = vmatpush.msra.mxu1 %v1328_v12 }
 0x14c   : > { %v2255_v16 = vpop.permute.xlu0 %738 }
 0x14d   : > { %1463 = vmatpush.msra.mxu1 %v1327_v7  ;;  %v870_v34 = vsel %vm587_vm7, %v864_v60, %v2255_v16  ;;  %v1740_v7 = vld [vmem:[%s1849_s17 + $0xf3] sm:$0x3f] }
 0x150   : > { %1092 = vrot.lane.b32.xlu2 %v1756_v19, %s1810_s25  ;;  %v1146_v19 = vsel %vm587_vm7, %v1140_v10, %v2221_v56  ;;  %v1326_v56 = vld [vmem:[%s2812_s1 + $0xc0] sm:$0xff] }
 0x151   : > { %816 = vrot.lane.b32.xlu1 %v1702_v18, %s1810_s25  ;;  %v1311_v18 = vld [vmem:[%s2812_s1 + $0x48] sm:$0xff]  ;;  %1464 = vmatpush.msra.mxu1 %v1326_v56  ;;  %v1691_v56 = vld [vmem:[%s1849_s17 + $0xb3] sm:$0x3f] }
 0x152   : > { %974 = vrot.lane.b32.xlu0 %v1727_v20, %s1811_s26  ;;  %v2274_v26 = vpop.permute.xlu2 %788  ;;  %v1343_v20 = vld [vmem:[%s2812_s1 + $0x148] sm:$0xff]  ;;  %1431 = vmatpush.msra.mxu0 %v1311_v18 }
 0x153   : > { %v2276_v28 = vpop.permute.xlu1 %1038  ;;  %1495 = vmatpush.msra.mxu2 %v1343_v20  ;;  %1465 = vmatpush.msra.mxu1 %v1325_v37  ;;  %v1117_v20 = vsel %vm2821_vm2, %v1111_v23, %v2231_v2  ;;  %v1321_v37 = vld [vmem:[%s2812_s1 + $0x98] sm:$0xff]  ;;  %v1751_v23 = vld [vmem:[%s1849_s17 + $0xe1] sm:$0x3f] }
 0x154   : > { %v2279_v31 = vpop.permute.xlu0 %922  ;;  %v1152_v22 = vsel %vm594_vm8, %v1146_v19, %v2276_v28  ;;  %1432 = vmatpush.msra.mxu0 %v1310_v21  ;;  %v1697_v19 = vld [vmem:[%s1849_s17 + $0xc0] sm:$0x3f]  ;;  %v876_v21 = vsel %vm594_vm8, %v870_v34, %v2255_v16  ;;  %v1692_v34 = vld [vmem:[%s1849_s17 + $0xd3] sm:$0x3f] }
 0x155   : > { %v1158_v38 = vsel %vm601_vm9, %v1152_v22, %v2276_v28  ;;  %v1308_v28 = vld [vmem:[%s2812_s1 + $0x30] sm:$0xff]  ;;  %1466 = vmatpush.msra.mxu1 %v1324_v49  ;;  %v1303_v49 = vld [vmem:[%s2812_s1 + $0x8] sm:$0xff] }
 0x156   : > { %v1164_v53 = vsel %vm2815_vm10, %v1158_v38, %v2251_v13  ;;  %v1337_v38 = vld [vmem:[%s2812_s1 + $0x118] sm:$0xff] }
 0x157   : > { %v1170_v5 = vsel %vm2816_vm11, %v1164_v53, %v2251_v13  ;;  %1467 = vmatpush.msra.mxu1 %v1323_v54  ;;  %v1338_v13 = vld [vmem:[%s2812_s1 + $0x120] sm:$0xff] }
 0x158   : > { %998 = vrot.lane.b32.xlu2 %v1733_v33, %s1806_s21  ;;  %v1309_v33 = vld [vmem:[%s2812_s1 + $0x38] sm:$0xff] }
 0x159   : > { %976 = vrot.lane.b32.xlu1 %v1728_v32, %s1811_s26  ;;  %v1342_v32 = vld [vmem:[%s2812_s1 + $0x140] sm:$0xff]  ;;  %1433 = vmatpush.msra.mxu0 %v1309_v33  ;;  %v1123_v33 = vsel %vm2818_vm3, %v1117_v20, %v2243_v8  ;;  %vm2823_vm3 = vcmask 1045506  }
 0x15a   : > { %722 = vrot.lane.b32.xlu0 %v1679_v42, %s1806_s21  ;;  %v2317_v55 = vpop.permute.xlu2 %1086  ;;  %v1686_v42 = vld [vmem:[%s1849_s17 + $0xd2] sm:$0x3f]  ;;  %1496 = vmatpush.msra.mxu2 %v1342_v32  ;;  %v1305_v32 = vld [vmem:[%s2812_s1 + $0x18] sm:$0xff] }
 0x15b   : > { %v2319_v57 = vpop.permute.xlu1 %946  ;;  %1434 = vmatpush.msra.mxu0 %v1308_v28  ;;  %v1176_v12 = vsel %vm622_vm12, %v1170_v5, %v2317_v55 }
 0x15c   : > { %v2323_v59 = vpop.permute.xlu0 %762  ;;  %1497 = vmatpush.msra.mxu2 %v1341_v45  ;;  %v1182_v2 = vsel %vm629_vm13, %v1176_v12, %v2317_v55  ;;  %v1129_v45 = vsel %vm2817_vm4, %v1123_v33, %v2243_v8  ;;  %vm2824_vm4 = vcmask 1043456  }
 0x15d   : > { %1435 = vmatpush.msra.mxu0 %v1307_v46  ;;  %v882_v16 = vsel %vm601_vm9, %v876_v21, %v2323_v59  ;;  %v1304_v59 = vld [vmem:[%s2812_s1 + $0x10] sm:$0xff]  ;;  %v1213_v47 = vrot.slane %v1182_v2, 4  ;;  %v1135_v60 = vsel %vm573_vm5, %v1129_v45, %v2253_v15 }
 0x15e   : > { %1498 = vmatpush.msra.mxu2 %v1340_v40 }
 0x160   : > { %1000 = vrot.lane.b32.xlu2 %v1734_v4, %s1806_s21  ;;  %v877_v4 = vsel %vm594_vm8, %v871_v51, %v2229_v0  ;;  %v1322_v0 = vld [vmem:[%s2812_s1 + $0xa0] sm:$0xff] }
 0x161   : > { %746 = vrot.lane.b32.xlu1 %v1685_v3, %s1807_s22  ;;  %v1339_v3 = vld [vmem:[%s2812_s1 + $0x128] sm:$0xff]  ;;  %1468 = vmatpush.msra.mxu1 %v1322_v0  ;;  %v1350_v51 = vld [vmem:[%s2812_s1 + $0x180] sm:$0xff]  ;;  %v1141_v0 = vsel %vm580_vm6, %v1135_v60, %v2253_v15 }
 0x162   : > { %724 = vrot.lane.b32.xlu0 %v1680_v11, %s1806_s21  ;;  %v2369_v25 = vpop.permute.xlu2 %812  ;;  %v1306_v11 = vld [vmem:[%s2812_s1 + $0x20] sm:$0xff]  ;;  %1499 = vmatpush.msra.mxu2 %v1339_v3 }
 0x163   : > { %v2367_v24 = vpop.permute.xlu1 %1040  ;;  %1436 = vmatpush.msra.mxu0 %v1306_v11  ;;  %1469 = vmatpush.msra.mxu1 %v1321_v37  ;;  %v1318_v11 = vld [vmem:[%s2812_s1 + $0x80] sm:$0xff] }
 0x164   : > { %v2374_v29 = vpop.permute.xlu0 %786  ;;  %1500 = vmatpush.msra.mxu2 %v1338_v13  ;;  %1536 = vmatpush.msra.mxu3 %v1350_v51  ;;  %v1244_v13 = vsel %vm1230_vm15, %v1213_v47, %v1214_v39 }
 0x165   : > { %1437 = vmatpush.msra.mxu0 %v1305_v32 }
 0x166   : > { %1501 = vmatpush.msra.mxu2 %v1337_v38 }
 0x167   : > { %1438 = vmatpush.msra.mxu0 %v1304_v59  ;;  %v1698_v59 = vld [vmem:[%s1849_s17 + $0xe0] sm:$0x3f] }
 0x168   : > { %748 = vrot.lane.b32.xlu2 %v1686_v42, %s1807_s22 }
 0x169   : > { %1046 = vrot.lane.b32.xlu1 %v1745_v36, %s1813_s28  ;;  %v888_v36 = vsel %vm2815_vm10, %v882_v16, %v2374_v29  ;;  %1439 = vmatpush.msra.mxu0 %v1303_v49  ;;  %v1147_v16 = vsel %vm587_vm7, %v1141_v0, %v2239_v6 }
 0x16a   : > { %1022 = vrot.lane.b32.xlu0 %v1739_v43, %s1807_s22  ;;  %v2430_v1 = vpop.permute.xlu2 %1018  ;;  %v1320_v43 = vld [vmem:[%s2812_s1 + $0x90] sm:$0xff]  ;;  %v894_v8 = vsel %vm2816_vm11, %v888_v36, %v2374_v29  ;;  %v1335_v29 = vld [vmem:[%s2812_s1 + $0x108] sm:$0xff]  ;;  %v1153_v38 = vsel %vm594_vm8, %v1147_v16, %v2367_v24  ;;  %v1703_v36 = vld [vmem:[%s1849_s17 + $0xc1] sm:$0x3f] }
 0x16b   : > { %v2428_v63 = vpop.permute.xlu1 %970  ;;  %1470 = vmatpush.msra.mxu1 %v1320_v43 }
 0x16c   : > { %v765_v10 = vpop.permute.xlu0 %764 }
 0x16d   : > { %v883_v17 = vsel %vm601_vm9, %v877_v4, %v765_v10  ;;  %v1746_v10 = vld [vmem:[%s1849_s17 + $0x100] sm:$0x3f]  ;;  %1471 = vmatpush.msra.mxu1 %v1319_v58 }
 0x16e   : > { %v889_v18 = vsel %vm2815_vm10, %v883_v17, %v2274_v26  ;;  %vm1232_vm10 = vcmask 1045508   ;;  %v1704_v58 = vld [vmem:[%s1849_s17 + $0xe1] sm:$0x3f] }
 0x16f   : > { %v895_v22 = vsel %vm2816_vm11, %v889_v18, %v2274_v26  ;;  %vm2826_vm11 = vcmask 1045504   ;;  %v1233_v12 = vsel %vm1232_vm10, %v1213_v47, %v1214_v39  ;;  %v1334_v18 = vld [vmem:[%s2812_s1 + $0x100] sm:$0xff]  ;;  %1472 = vmatpush.msra.mxu1 %v1318_v11 }
 0x170   : > { %v901_v26 = vsel %vm622_vm12, %v895_v22, %v2369_v25  ;;  %794 = vrot.lane.b32.xlu2 %v1697_v19, %s1814_s29  ;;  %v1239_v17 = vsel %vm2826_vm11, %v1214_v39, %v1213_v47 }
 0x171   : > { %v907_v55 = vsel %vm629_vm13, %v901_v26, %v2369_v25  ;;  %1024 = vrot.lane.b32.xlu1 %v1740_v7, %s1807_s22  ;;  %v1336_v25 = vld [vmem:[%s2812_s1 + $0x110] sm:$0xff]  ;;  %v1707_v7 = vld [vmem:[%s1849_s17 + $0x82] sm:$0x3f] }
 0x172   : > { %v1215_v42 = vrot.slane %v907_v55, 6  ;;  %770 = vrot.lane.b32.xlu0 %v1691_v56, %s1808_s23  ;;  %v2504_v28 = vpop.permute.xlu2 %766  ;;  %1502 = vmatpush.msra.mxu2 %v1336_v25  ;;  %v1106_v2 = vsel %vm2819_vm0, %v1707_v7, %v2279_v31  ;;  %v1752_v55 = vld [vmem:[%s1849_s17 + $0x101] sm:$0x3f]  ;;  %v1159_v31 = vsel %vm601_vm9, %v1153_v38, %v2367_v24  ;;  %vm2827_vm0 = vcmask 326656  }
 0x173   : > { %v2502_v48 = vpop.permute.xlu1 %1064  ;;  %v1112_v37 = vsel %vm2820_vm1, %v1106_v2, %v2319_v57  ;;  %vm2828_vm1 = vcmask 785408   ;;  %v1760_v25 = vld [vmem:[%s1849_s17 + $0x83] sm:$0x3f] }
 0x174   : > { %v811_v53 = vpop.permute.xlu0 %810  ;;  %v2516_v40 = vsel %vm1230_vm15, %v2106_v27, %v1215_v42  ;;  %v2520_v46 = vsel %vm2822_vm14, %v2106_v27, %v1215_v42  ;;  %v2524_v54 = vsel %vm1232_vm10, %v2106_v27, %v1215_v42  ;;  %v1302_v27 = vld [vmem:[%s2812_s1] sm:$0xff]  ;;  %1503 = vmatpush.msra.mxu2 %v1335_v29  ;;  %v1118_v42 = vsel %vm2821_vm2, %v1112_v37, %v2319_v57 }
 0x175   : > { %v900_v3 = vsel %vm622_vm12, %v894_v8, %v811_v53  ;;  %1440 = vmatpush.msra.mxu0 %v1302_v27  ;;  %v1124_v6 = vsel %vm2827_vm0, %v1118_v42, %v2428_v63  ;;  %v1165_v43 = vsel %vm2828_vm1, %v1159_v31, %v2502_v48  ;;  %vm2829_vm2 = vcmask 392192   ;;  %v1758_v29 = vld [vmem:[%s1849_s17 + $0x102] sm:$0x3f]  ;;  %vm2831_vm0 = vmmov %vm2828_vm1 }
 0x176   : > { %v906_v4 = vsel %vm629_vm13, %v900_v3, %v811_v53  ;;  %1504 = vmatpush.msra.mxu2 %v1334_v18  ;;  %v1130_v24 = vsel %vm2829_vm2, %v1124_v6, %v2428_v63  ;;  %v1217_v51 = vrot.slane %v1760_v25, 2  ;;  %v1757_v3 = vld [vmem:[%s1849_s17 + $0xe2] sm:$0x3f]  ;;  %vm2825_vm2 = vcmask 64512  }
 0x177   : > { %v1212_v5 = vrot.slane %v906_v4, 6 }
 0x178   : > { %772 = vrot.lane.b32.xlu2 %v1692_v34, %s1808_s23 }
 0x179   : > { %v1231_v19 = vsel %vm1230_vm15, %v2111_v30, %v1212_v5  ;;  %v1237_v20 = vsel %vm2822_vm14, %v2111_v30, %v1212_v5  ;;  %v1243_v15 = vsel %vm1232_vm10, %v2111_v30, %v1212_v5  ;;  %1070 = vrot.lane.b32.xlu1 %v1751_v23, %s1814_s29  ;;  %vm2830_vm14 = vcmask 850944  }
 0x17a   : > { %v1235_v21 = vsel %vm2824_vm4, %v1231_v19, %v1233_v12  ;;  %v1241_v22 = vsel %vm2823_vm3, %v1237_v20, %v1239_v17  ;;  %v1245_v56 = vsel %vm2824_vm4, %v1244_v13, %v1243_v15  ;;  %1048 = vrot.lane.b32.xlu0 %v1746_v10, %s1813_s28  ;;  %v1067_v35 = vpop.permute.xlu2 %1066  ;;  %v1171_v39 = vsel %vm2830_vm14, %v1165_v43, %v2502_v48  ;;  %vm2832_vm1 = vmmov %vm2830_vm14 }
 0x17b   : > { %v1242_v32 = vrot.slane %v1241_v22, 2  ;;  %v1246_v33 = vrot.slane %v1245_v56, 4  ;;  %1355 = vst [vmem:[#allocation1] ss:$4 sm:$0xff] %v1235_v21  ;;  %v995_v30 = vpop.permute.xlu1 %994  ;;  %vm2833_vm14 = vmmov %vm2831_vm0 }
 0x17c   : > { %v719_v26 = vpop.permute.xlu0 %718  ;;  %v1136_v49 = vsel %vm573_vm5, %v1130_v24, %v995_v30 }
 0x17d   : > { %1357 = vst [vmem:[#allocation1 + $0x1] ss:$4 sm:$0xff] %v1242_v32  ;;  %v1142_v27 = vsel %vm580_vm6, %v1136_v49, %v995_v30 }
 0x17e   : > { %1359 = vst [vmem:[#allocation1 + $0x2] ss:$4 sm:$0xff] %v1246_v33  ;;  %v1148_v12 = vsel %vm587_vm7, %v1142_v27, %v2430_v1 }
 0x180   : > { %1072 = vrot.lane.b32.xlu2 %v1752_v55, %s1814_s29 }
 0x181   : > { %818 = vrot.lane.b32.xlu1 %v1703_v36, %s1810_s25 }
 0x182   : > { %796 = vrot.lane.b32.xlu0 %v1698_v59, %s1814_s29  ;;  %v1091_v45 = vpop.permute.xlu2 %1090 }
 0x183   : > { %v743_v57 = vpop.permute.xlu1 %742 }
 0x184   : > { %v1089_v47 = vpop.permute.xlu0 %1088 }
 0x185   : > { %v1177_v8 = vsel %vm622_vm12, %v1171_v39, %v1089_v47 }
 0x186   : > { %v1183_v53 = vsel %vm629_vm13, %v1177_v8, %v1089_v47 }
 0x187   : > { %v1216_v60 = vrot.slane %v1183_v53, 4 }
 0x188   : > { %1096 = vrot.lane.b32.xlu2 %v1758_v29, %s1810_s25 }
 0x189   : > { %v1248_v4 = vsel %vm1232_vm10, %v1216_v60, %v1217_v51  ;;  %v1251_v63 = vsel %vm2826_vm11, %v1217_v51, %v1216_v60  ;;  %v1255_v48 = vsel %vm1230_vm15, %v1216_v60, %v1217_v51  ;;  %820 = vrot.lane.b32.xlu1 %v1704_v58, %s1810_s25 }
 0x18a   : > { %v1249_v23 = vsel %vm2824_vm4, %v2516_v40, %v1248_v4  ;;  %v1252_v34 = vsel %vm2823_vm3, %v2520_v46, %v1251_v63  ;;  %v1256_v5 = vsel %vm2824_vm4, %v1255_v48, %v2524_v54  ;;  %1094 = vrot.lane.b32.xlu0 %v1757_v3, %s1810_s25  ;;  %v2614_v17 = vpop.permute.xlu2 %744  ;;  %v860_v46 = vsel %vm573_vm5, %v2148_v62, %v719_v26  ;;  %v1708_v3 = vld [vmem:[%s1849_s17 + $0xa2] sm:$0x3f]  ;;  %s1773_s25 = smul.u32 40, %s2882_s13 }
 0x18b   : > { %v1253_v10 = vrot.slane %v1252_v34, 2  ;;  %v1257_v11 = vrot.slane %v1256_v5, 4  ;;  %1361 = vst [vmem:[#allocation1 + $0x3] ss:$4 sm:$0xff] %v1249_v23  ;;  %v1043_v0 = vpop.permute.xlu1 %1042  ;;  %v866_v7 = vsel %vm580_vm6, %v860_v46, %v719_v26  ;;  %v1761_v26 = vld [vmem:[%s1849_s17 + $0xa3] sm:$0x3f] }
 0x18c   : > { %v1154_v13 = vsel %vm594_vm8, %v1148_v12, %v1043_v0  ;;  %v925_v40 = vpop.permute.xlu0 %924  ;;  %v872_v19 = vsel %vm587_vm7, %v866_v7, %v743_v57  ;;  %v1220_v36 = vrot.slane %v1761_v26, 2  ;;  %v1762_v26 = vld [vmem:[%s1849_s17 + $0xc3] sm:$0x3f]  ;;  %s2797_s8 = scalar_lea.vmem %s2814_s3, %s1773_s25 }
 0x18d   : > { %1363 = vst [vmem:[#allocation1 + $0x20] ss:$4 sm:$0xff] %v1253_v10  ;;  %v1160_v54 = vsel %vm601_vm9, %v1154_v13, %v1043_v0  ;;  %v878_v56 = vsel %vm594_vm8, %v872_v19, %v743_v57 }
 0x18e   : > { %1365 = vst [vmem:[#allocation1 + $0x21] ss:$4 sm:$0xff] %v1257_v11  ;;  %v1166_v18 = vsel %vm2831_vm0, %v1160_v54, %v1067_v35  ;;  %vm2834_vm0 = vmmov %vm2832_vm1 }
 0x18f   : > { %v1172_v1 = vsel %vm2832_vm1, %v1166_v18, %v1067_v35  ;;  %v884_v35 = vsel %vm601_vm9, %v878_v56, %v2504_v28  ;;  %vm2835_vm1 = vcmask 1043458  }
 0x190   : > { %v1178_v30 = vsel %vm622_vm12, %v1172_v1, %v1091_v45 }
 0x191   : > { %v1184_v2 = vsel %vm629_vm13, %v1178_v30, %v1091_v45 }
 0x192   : > { %v1370_v20 = vld.sshfl [vmem:[#allocation1] sm:$0xff pattern:$0x73625140]  ;;  %v1371_v15 = vld.sshfl [vmem:[#allocation1 + $0x8] sm:$0xff pattern:$0x73625140]  ;;  %v2624_v62 = vpop.permute.xlu2 %1044 }
 0x193   : > { %1441 = vmatmul.f32.vlgmr.msra.gmra.mxu0 %v1370_v20  ;;  %v1372_v21 = vld.sshfl [vmem:[#allocation1 + $0x10] sm:$0xff pattern:$0x73625140]  ;;  %v791_v22 = vpop.permute.xlu1 %790  ;;  %1473 = vmatmul.f32.vlgmr.msra.gmra.mxu1 %v1371_v15  ;;  %v1373_v32 = vld.sshfl [vmem:[#allocation1 + $0x18] sm:$0xff pattern:$0x73625140] }
 0x194   : > { %1505 = vmatmul.f32.vlgmr.msra.gmra.mxu2 %v1372_v21  ;;  %v949_v33 = vpop.permute.xlu0 %948  ;;  %1765 = vmatmul.msk.f32.vlgmr.msra.gmra.mxu3 %vm2825_vm2, %v1373_v32  ;;  %v890_v16 = vsel %vm2833_vm14, %v884_v35, %v791_v22  ;;  %v1219_v37 = vrot.slane %v1184_v2, 4  ;;  %vm2836_vm14 = vcmask 130048  }
 0x195   : > { %v896_v38 = vsel %vm2834_vm0, %v890_v16, %v791_v22  ;;  %vm2837_vm0 = vcmask 195584  }
 0x196   : > { %v1259_v28 = vsel %vm1232_vm10, %v1219_v37, %v1220_v36  ;;  %v1262_v25 = vsel %vm2826_vm11, %v1220_v36, %v1219_v37  ;;  %v1266_v39 = vsel %vm1230_vm15, %v1219_v37, %v1220_v36 }
 0x19a   : > { %v2635_v59 = vpop.permute.xlu2 %792 }
 0x19b   : > { %v815_v55 = vpop.permute.xlu1 %814 }
 0x19c   : > { %v902_v42 = vsel %vm622_vm12, %v896_v38, %v815_v55  ;;  %v973_v31 = vpop.permute.xlu0 %972  ;;  %v1223_v38 = vrot.slane %v1762_v26, 2 }
 0x19d   : > { %v908_v6 = vsel %vm629_vm13, %v902_v42, %v815_v55 }
 0x19e   : > { %v1218_v43 = vrot.slane %v908_v6, 6 }
 0x1a0   : > { %v1258_v57 = vsel %vm1230_vm15, %v2072_v61, %v1218_v43  ;;  %v1261_v45 = vsel %vm2835_vm1, %v2072_v61, %v1218_v43  ;;  %v1265_v24 = vsel %vm1232_vm10, %v2072_v61, %v1218_v43  ;;  %v1107_v61 = vsel %vm2836_vm14, %v1708_v3, %v925_v40 }
 0x1a1   : > { %v1260_v47 = vsel %vm2824_vm4, %v1258_v57, %v1259_v28  ;;  %v1263_v49 = vsel %vm2823_vm3, %v1261_v45, %v1262_v25  ;;  %v1267_v51 = vsel %vm2824_vm4, %v1266_v39, %v1265_v24  ;;  %v1113_v27 = vsel %vm2837_vm0, %v1107_v61, %v949_v33 }
 0x1a2   : > { %v1264_v8 = vrot.slane %v1263_v49, 2  ;;  %v1268_v53 = vrot.slane %v1267_v51, 4  ;;  %1367 = vst [vmem:[#allocation1 + $0x22] ss:$4 sm:$0xff] %v1260_v47  ;;  %v2651_v29 = vpop.permute.xlu2 %952  ;;  %vm2838_vm1 = vcmask 261120   ;;  %vm2839_vm3 = vcmask 326656  }
 0x1a3   : > { %v997_v58 = vpop.permute.xlu1 %996  ;;  %v1119_v23 = vsel %vm2838_vm1, %v1113_v27, %v949_v33  ;;  %vm2840_vm14 = vcmask 392192   ;;  %vm2842_vm0 = vcmask 850944  }
 0x1a4   : > { %1369 = vst [vmem:[#allocation1 + $0x23] ss:$4 sm:$0xff] %v1264_v8  ;;  %v721_v60 = vpop.permute.xlu0 %720  ;;  %v1125_v11 = vsel %vm2839_vm3, %v1119_v23, %v973_v31  ;;  %vm2841_vm3 = vcmask 785408   ;;  %v1710_v23 = vld [vmem:[%s1849_s17 + $0xe2] sm:$0x3f] }
 0x1a5   : > { %1378 = vst [vmem:[#allocation1] ss:$4 sm:$0xff] %v1268_v53  ;;  %v1131_v12 = vsel %vm2840_vm14, %v1125_v11, %v973_v31  ;;  %v861_v40 = vsel %vm573_vm5, %v2213_v52, %v721_v60  ;;  %vm2843_vm1 = vmmov %vm2841_vm3 }
 0x1a6   : > { %v1137_v13 = vsel %vm573_vm5, %v1131_v12, %v997_v58  ;;  %v867_v19 = vsel %vm580_vm6, %v861_v40, %v721_v60  ;;  %vm2844_vm14 = vmmov %vm2842_vm0 }
 0x1a7   : > { %v1143_v54 = vsel %vm580_vm6, %v1137_v13, %v997_v58  ;;  %v873_v15 = vsel %vm587_vm7, %v867_v19, %v2614_v17 }
 0x1a8   : > { %v879_v22 = vsel %vm594_vm8, %v873_v15, %v2614_v17 }
 0x1aa   : > { %v1093_v0 = vpop.permute.xlu2 %1092 }
 0x1ab   : > { %v2656_v4 = vpop.permute.xlu1 %926  ;;  %v1374_v63 = vld.sshfl [vmem:[#allocation1 + $0x20] sm:$0xff pattern:$0x73625140]  ;;  %v1375_v48 = vld.sshfl [vmem:[#allocation1 + $0x28] sm:$0xff pattern:$0x73625140] }
 0x1ac   : > { %v1021_v34 = vpop.permute.xlu0 %1020  ;;  %1444 = vmatmul.f32.gmra.mxu0 %v1374_v63  ;;  %1476 = vmatmul.f32.gmra.mxu1 %v1375_v48  ;;  %v1376_v5 = vld.sshfl [vmem:[#allocation1 + $0x30] sm:$0xff pattern:$0x73625140]  ;;  %v1377_v10 = vld.sshfl [vmem:[#allocation1 + $0x38] sm:$0xff pattern:$0x73625140] }
 0x1ad   : > { %1508 = vmatmul.f32.gmra.mxu2 %v1376_v5  ;;  %1766 = vmatmul.msk.f32.gmra.mxu3 %vm2825_vm2, %v1377_v10  ;;  %v1149_v7 = vsel %vm587_vm7, %v1143_v54, %v1021_v34 }
 0x1ae   : > { %v1155_v20 = vsel %vm594_vm8, %v1149_v7, %v2624_v62 }
 0x1af   : > { %v1161_v52 = vsel %vm601_vm9, %v1155_v20, %v2624_v62 }
 0x1b2   : > { %v2670_v1 = vpop.permute.xlu2 %998 }
 0x1b3   : > { %v2665_v46 = vpop.permute.xlu1 %950 }
 0x1b4   : > { %v769_v18 = vpop.permute.xlu0 %768 }
 0x1b5   : > { %v885_v33 = vsel %vm601_vm9, %v879_v22, %v769_v18 }
 0x1b6   : > { %v891_v2 = vsel %vm2843_vm1, %v885_v33, %v2635_v59  ;;  %vm2847_vm1 = vcmask 130048  }
 0x1b7   : > { %v897_v17 = vsel %vm2844_vm14, %v891_v2, %v2635_v59  ;;  %vm2848_vm14 = vcmask 195584  }
 0x1ba   : > { %v1001_v37 = vpop.permute.xlu2 %1000 }
 0x1bb   : > { %v1069_v21 = vpop.permute.xlu1 %1068 }
 0x1bc   : > { %v1167_v56 = vsel %vm2841_vm3, %v1161_v52, %v1069_v21  ;;  %v929_v32 = vpop.permute.xlu0 %928  ;;  %vm2845_vm3 = vcmask 1043458  }
 0x1bd   : > { %v1173_v30 = vsel %vm2842_vm0, %v1167_v56, %v1069_v21  ;;  %vm2846_vm0 = vcmask 1045506   ;;  %v1109_v34 = vsel %vm2847_vm1, %v1710_v23, %v929_v32 }
 0x1be   : > { %v1179_v35 = vsel %vm622_vm12, %v1173_v30, %v1093_v0  ;;  %v1115_v11 = vsel %vm2848_vm14, %v1109_v34, %v2651_v29 }
 0x1bf   : > { %v1185_v16 = vsel %vm629_vm13, %v1179_v35, %v1093_v0  ;;  %v1709_v0 = vld [vmem:[%s1849_s17 + $0xc2] sm:$0x3f] }
 0x1c0   : > { %v1222_v62 = vrot.slane %v1185_v16, 4 }
 0x1c2   : > { %v1270_v43 = vsel %vm1232_vm10, %v1222_v62, %v1223_v38  ;;  %v1273_v28 = vsel %vm2826_vm11, %v1223_v38, %v1222_v62  ;;  %v1277_v59 = vsel %vm1230_vm15, %v1222_v62, %v1223_v38  ;;  %v749_v8 = vpop.permute.xlu2 %748 }
 0x1c3   : > { %v817_v36 = vpop.permute.xlu1 %816 }
 0x1c4   : > { %v903_v55 = vsel %vm622_vm12, %v897_v17, %v817_v36  ;;  %v975_v42 = vpop.permute.xlu0 %974 }
 0x1c5   : > { %v909_v31 = vsel %vm629_vm13, %v903_v55, %v817_v36 }
 0x1c6   : > { %v1221_v6 = vrot.slane %v909_v31, 6 }
 0x1c8   : > { %v1269_v25 = vsel %vm1230_vm15, %v2129_v44, %v1221_v6  ;;  %v1272_v57 = vsel %vm2845_vm3, %v2129_v44, %v1221_v6  ;;  %v1276_v45 = vsel %vm1232_vm10, %v2129_v44, %v1221_v6  ;;  %vm2849_vm3 = vcmask 261120  }
 0x1c9   : > { %v1271_v24 = vsel %vm2824_vm4, %v1269_v25, %v1270_v43  ;;  %v1274_v39 = vsel %vm2846_vm0, %v1272_v57, %v1273_v28  ;;  %v1278_v47 = vsel %vm2824_vm4, %v1277_v59, %v1276_v45  ;;  %v1121_v13 = vsel %vm2849_vm3, %v1115_v11, %v2651_v29  ;;  %vm2850_vm0 = vmmov %vm2847_vm1 }
 0x1ca   : > { %v1275_v49 = vrot.slane %v1274_v39, 2  ;;  %v1279_v51 = vrot.slane %v1278_v47, 4  ;;  %1379 = vst [vmem:[#allocation1 + $0x1] ss:$4 sm:$0xff] %v1271_v24  ;;  %v795_v27 = vpop.permute.xlu2 %794  ;;  %v1108_v40 = vsel %vm2850_vm0, %v1709_v0, %v2656_v4  ;;  %vm2851_vm4 = vcmask 326656  }
 0x1cb   : > { %v977_v53 = vpop.permute.xlu1 %976  ;;  %vm2853_vm1 = vcmask 392192   ;;  %vm2855_vm11 = vmmov %vm2851_vm4 }
 0x1cc   : > { %1380 = vst [vmem:[#allocation1 + $0x2] ss:$4 sm:$0xff] %v1275_v49  ;;  %v723_v58 = vpop.permute.xlu0 %722  ;;  %v1127_v54 = vsel %vm2851_vm4, %v1121_v13, %v977_v53  ;;  %vm2856_vm4 = vmmov %vm2853_vm1 }
 0x1cd   : > { %1381 = vst [vmem:[#allocation1 + $0x3] ss:$4 sm:$0xff] %v1279_v51  ;;  %v1133_v20 = vsel %vm2853_vm1, %v1127_v54, %v977_v53  ;;  %v862_v15 = vsel %vm573_vm5, %v2209_v50, %v723_v58  ;;  %v1764_v53 = vld [vmem:[%s1849_s17 + $0x103] sm:$0x3f]  ;;  %vm2866_vm1 = vcmask 1045504  }
 0x1ce   : > { %v1139_v4 = vsel %vm573_vm5, %v1133_v20, %v1001_v37  ;;  %v868_v22 = vsel %vm580_vm6, %v862_v15, %v723_v58 }
 0x1cf   : > { %v1145_v30 = vsel %vm580_vm6, %v1139_v4, %v1001_v37 }
 0x1d2   : > { %v773_v12 = vpop.permute.xlu2 %772 }
 0x1d3   : > { %v747_v60 = vpop.permute.xlu1 %746 }
 0x1d4   : > { %v725_v44 = vpop.permute.xlu0 %724  ;;  %v1386_v3 = vld.sshfl [vmem:[#allocation1] sm:$0xff pattern:$0x73625140]  ;;  %v1387_v61 = vld.sshfl [vmem:[#allocation1 + $0x8] sm:$0xff pattern:$0x73625140]  ;;  %v874_v56 = vsel %vm587_vm7, %v868_v22, %v747_v60 }
 0x1d5   : > { %1447 = vmatmul.f32.gmra.mxu0 %v1386_v3  ;;  %1479 = vmatmul.f32.gmra.mxu1 %v1387_v61  ;;  %v1388_v63 = vld.sshfl [vmem:[#allocation1 + $0x10] sm:$0xff pattern:$0x73625140]  ;;  %v1389_v48 = vld.sshfl [vmem:[#allocation1 + $0x18] sm:$0xff pattern:$0x73625140]  ;;  %v863_v33 = vsel %vm573_vm5, %v2165_v14, %v725_v44  ;;  %v880_v35 = vsel %vm594_vm8, %v874_v56, %v747_v60 }
 0x1d6   : > { %1511 = vmatmul.f32.gmra.mxu2 %v1388_v63  ;;  %1767 = vmatmul.msk.f32.gmra.mxu3 %vm2825_vm2, %v1389_v48  ;;  %vm2852_vm2 = vmmov %vm2848_vm14  ;;  %v869_v38 = vsel %vm580_vm6, %v863_v33, %v725_v44  ;;  %v1763_v61 = vld [vmem:[%s1849_s17 + $0xe3] sm:$0x3f] }
 0x1d7   : > { %v1114_v18 = vsel %vm2852_vm2, %v1108_v40, %v2665_v46  ;;  %vm2854_vm14 = vmmov %vm2849_vm3  ;;  %v875_v55 = vsel %vm587_vm7, %v869_v38, %v749_v8  ;;  %v1226_v0 = vrot.slane %v1763_v61, 2 }
 0x1d8   : > { %v1120_v21 = vsel %vm2854_vm14, %v1114_v18, %v2665_v46  ;;  %v881_v25 = vsel %vm594_vm8, %v875_v55, %v749_v8 }
 0x1d9   : > { %v1126_v29 = vsel %vm2855_vm11, %v1120_v21, %v975_v42  ;;  %vm2857_vm11 = vcmask 785408   ;;  %v887_v47 = vsel %vm601_vm9, %v881_v25, %v773_v12 }
 0x1da   : > { %v1073_v52 = vpop.permute.xlu2 %1072  ;;  %v1132_v32 = vsel %vm2856_vm4, %v1126_v29, %v975_v42  ;;  %vm2858_vm2 = vmmov %vm2857_vm11  ;;  %vm2869_vm4 = vcmask 1045506  }
 0x1db   : > { %v1047_v5 = vpop.permute.xlu1 %1046  ;;  %v1138_v16 = vsel %vm573_vm5, %v1132_v32, %v2670_v1  ;;  %vm2859_vm5 = vcmask 850944  }
 0x1dc   : > { %v1023_v10 = vpop.permute.xlu0 %1022  ;;  %v1144_v37 = vsel %vm580_vm6, %v1138_v16, %v2670_v1  ;;  %vm2860_vm3 = vmmov %vm2859_vm5  ;;  %vm2861_vm6 = vcmask 1043458  }
 0x1dd   : > { %v1150_v42 = vsel %vm587_vm7, %v1144_v37, %v1023_v10  ;;  %vm2865_vm0 = vmmov %vm2860_vm3 }
 0x1de   : > { %v1156_v57 = vsel %vm594_vm8, %v1150_v42, %v1047_v5  ;;  %vm2867_vm14 = vmmov %vm2861_vm6 }
 0x1df   : > { %v1162_v49 = vsel %vm601_vm9, %v1156_v57, %v1047_v5 }
 0x1e2   : > { %v1097_v31 = vpop.permute.xlu2 %1096 }
 0x1e3   : > { %v1025_v7 = vpop.permute.xlu1 %1024 }
 0x1e4   : > { %v771_v19 = vpop.permute.xlu0 %770  ;;  %v1151_v46 = vsel %vm587_vm7, %v1145_v30, %v1025_v7  ;;  %vm2862_vm7 = vmmov %vm2858_vm2 }
 0x1e5   : > { %v886_v26 = vsel %vm601_vm9, %v880_v35, %v771_v19 }
 0x1e6   : > { %v892_v17 = vsel %vm2858_vm2, %v886_v26, %v795_v27 }
 0x1e7   : > { %v898_v28 = vsel %vm2860_vm3, %v892_v17, %v795_v27  ;;  %v1229_v27 = vrot.slane %v1764_v53, 2 }
 0x1eb   : > { %v1071_v50 = vpop.permute.xlu1 %1070 }
 0x1ec   : > { %v1049_v2 = vpop.permute.xlu0 %1048 }
 0x1ed   : > { %v1157_v62 = vsel %vm594_vm8, %v1151_v46, %v1049_v2  ;;  %vm2863_vm8 = vmmov %vm2858_vm2 }
 0x1ee   : > { %v1163_v36 = vsel %vm601_vm9, %v1157_v62, %v1049_v2  ;;  %v1168_v3 = vsel %vm2863_vm8, %v1162_v49, %v1071_v50  ;;  %vm2864_vm9 = vmmov %vm2860_vm3  ;;  %v1794_v2 = vld [vmem:[%s2813_s2] ss:$0 sm:$0xff] }
 0x1ef   : > { %v1169_v14 = vsel %vm2857_vm11, %v1163_v36, %v1073_v52  ;;  %v1174_v34 = vsel %vm2865_vm0, %v1168_v3, %v1071_v50  ;;  %vm2872_vm2 = vmmov %vm2866_vm1  ;;  %vm1557_vm0 = vcmask 125952  }
 0x1f0   : > { %v1175_v6 = vsel %vm2859_vm5, %v1169_v14, %v1073_v52  ;;  %vm2873_vm5 = vmmov %vm2869_vm4 }
 0x1f1   : > { %v1181_v1 = vsel %vm622_vm12, %v1175_v6, %v1097_v31 }
 0x1f2   : > { %v1187_v51 = vsel %vm629_vm13, %v1181_v1, %v1097_v31 }
 0x1f3   : > { %v819_v43 = vpop.permute.xlu1 %818  ;;  %v1228_v63 = vrot.slane %v1187_v51, 4 }
 0x1f4   : > { %v904_v45 = vsel %vm622_vm12, %v898_v28, %v819_v43  ;;  %v797_v59 = vpop.permute.xlu0 %796 }
 0x1f5   : > { %v910_v24 = vsel %vm629_vm13, %v904_v45, %v819_v43  ;;  %v893_v44 = vsel %vm2862_vm7, %v887_v47, %v797_v59  ;;  %v1292_v40 = vsel %vm1232_vm10, %v1228_v63, %v1229_v27  ;;  %v1295_v54 = vsel %vm2866_vm1, %v1229_v27, %v1228_v63 }
 0x1f6   : > { %v1224_v39 = vrot.slane %v910_v24, 6  ;;  %v899_v48 = vsel %vm2864_vm9, %v893_v44, %v797_v59  ;;  %v1299_v7 = vsel %vm1230_vm15, %v1228_v63, %v1229_v27 }
 0x1f8   : > { %v1280_v8 = vsel %vm1230_vm15, %v2124_v41, %v1224_v39  ;;  %v1283_v58 = vsel %vm2861_vm6, %v2124_v41, %v1224_v39  ;;  %v1287_v60 = vsel %vm1232_vm10, %v2124_v41, %v1224_v39  ;;  %vm2877_vm6 = vcmask 130048  }
 0x1f9   : > { %vm2878_vm7 = vmmov %vm2877_vm6 }
 0x1fa   : > { %vm2879_vm8 = vmmov %vm2877_vm6 }
 0x1fb   : > { %v821_v23 = vpop.permute.xlu1 %820  ;;  %vm2880_vm9 = vmmov %vm2877_vm6 }
 0x1fc   : > { %v905_v5 = vsel %vm622_vm12, %v899_v48, %v821_v23  ;;  %v1095_v10 = vpop.permute.xlu0 %1094 }
 0x1fd   : > { %v911_v11 = vsel %vm629_vm13, %v905_v5, %v821_v23  ;;  %v1180_v41 = vsel %vm622_vm12, %v1174_v34, %v1095_v10  ;;  %vm2868_vm12 = vcmask 1043456  }
 0x1fe   : > { %v1227_v12 = vrot.slane %v911_v11, 6  ;;  %v1186_v13 = vsel %vm629_vm13, %v1180_v41, %v1095_v10  ;;  %vm2870_vm13 = vmmov %vm2868_vm12 }
 0x1ff   : > { %v1225_v18 = vrot.slane %v1186_v13, 4  ;;  %vm2871_vm11 = vmmov %vm2868_vm12 }
 0x200   : > { %v1291_v19 = vsel %vm1230_vm15, %v2086_v9, %v1227_v12  ;;  %v1294_v20 = vsel %vm2867_vm14, %v2086_v9, %v1227_v12  ;;  %v1298_v15 = vsel %vm1232_vm10, %v2086_v9, %v1227_v12  ;;  %vm2874_vm3 = vmmov %vm2871_vm11 }
 0x201   : > { %v1293_v21 = vsel %vm2868_vm12, %v1291_v19, %v1292_v40  ;;  %v1296_v29 = vsel %vm2869_vm4, %v1294_v20, %v1295_v54  ;;  %v1300_v52 = vsel %vm2870_vm13, %v1299_v7, %v1298_v15  ;;  %v1281_v4 = vsel %vm1232_vm10, %v1225_v18, %v1226_v0 }
 0x202   : > { %v1297_v22 = vrot.slane %v1296_v29, 2  ;;  %v1301_v56 = vrot.slane %v1300_v52, 4  ;;  %1385 = vst [vmem:[#allocation1 + $0x23] ss:$4 sm:$0xff] %v1293_v21  ;;  %v1282_v32 = vsel %vm2871_vm11, %v1280_v8, %v1281_v4  ;;  %v1284_v33 = vsel %vm2872_vm2, %v1226_v0, %v1225_v18 }
 0x203   : > { %v1285_v30 = vsel %vm2873_vm5, %v1283_v58, %v1284_v33  ;;  %v1288_v50 = vsel %vm1230_vm15, %v1225_v18, %v1226_v0  ;;  %1382 = vst [vmem:[#allocation1 + $0x20] ss:$4 sm:$0xff] %v1282_v32  ;;  %vm2875_vm10 = vcmask 64512  }
 0x204   : > { %1394 = vst [vmem:[#allocation1] ss:$4 sm:$0xff] %v1297_v22  ;;  %v1286_v9 = vrot.slane %v1285_v30, 2  ;;  %v1289_v35 = vsel %vm2874_vm3, %v1288_v50, %v1287_v60  ;;  %vm2876_vm15 = vmmov %vm2875_vm10 }
 0x205   : > { %1395 = vst [vmem:[#allocation1 + $0x1] ss:$4 sm:$0xff] %v1301_v56  ;;  %v1290_v46 = vrot.slane %v1289_v35, 4 }
 0x206   : > { %1383 = vst [vmem:[#allocation1 + $0x21] ss:$4 sm:$0xff] %v1286_v9 }
 0x207   : > { %1384 = vst [vmem:[#allocation1 + $0x22] ss:$4 sm:$0xff] %v1290_v46 }
 0x20c   : > { %v1396_v55 = vld.sshfl [vmem:[#allocation1] sm:$0xff pattern:$0x73625140]  ;;  %v1397_v42 = vld.sshfl [vmem:[#allocation1 + $0x8] sm:$0xff pattern:$0x73625140] }
 0x20d   : > { %v1398_v31 = vld.sshfl [vmem:[#allocation1 + $0x10] sm:$0xff pattern:$0x73625140]  ;;  %v1399_v6 = vld.sshfl [vmem:[#allocation1 + $0x18] sm:$0xff pattern:$0x73625140] }
 0x20e   : > { %v1390_v16 = vld.sshfl [vmem:[#allocation1 + $0x20] sm:$0xff pattern:$0x73625140]  ;;  %v1391_v26 = vld.sshfl [vmem:[#allocation1 + $0x28] sm:$0xff pattern:$0x73625140] }
 0x20f   : > { %1450 = vmatmul.f32.gmra.mxu0 %v1390_v16  ;;  %1482 = vmatmul.f32.gmra.mxu1 %v1391_v26  ;;  %v1392_v62 = vld.sshfl [vmem:[#allocation1 + $0x30] sm:$0xff pattern:$0x73625140]  ;;  %v1393_v38 = vld.sshfl [vmem:[#allocation1 + $0x38] sm:$0xff pattern:$0x73625140] }
 0x210   : > { %1514 = vmatmul.f32.gmra.mxu2 %v1392_v62  ;;  %1768 = vmatmul.msk.f32.gmra.mxu3 %vm2875_vm10, %v1393_v38  ;;  %v1442_v36 = vpop.f32.mrf.mxu0  ;;  %v1474_v37 = vpop.f32.mrf.mxu1 }
 0x211   : > { %v1443_v14 = vadd.f32 %v1794_v2, %v1442_v36 }
 0x213   : > { %v1475_v17 = vadd.f32 %v1474_v37, %v1443_v14 }
 0x217   : > { %1453 = vmatmul.f32.gmra.mxu0 %v1396_v55  ;;  %1485 = vmatmul.f32.gmra.mxu1 %v1397_v42  ;;  %v1506_v43 = vpop.f32.mrf.mxu2  ;;  %v1538_v25 = vpop.f32.mrf.mxu3 }
 0x218   : > { %1517 = vmatmul.f32.gmra.mxu2 %v1398_v31  ;;  %1769 = vmatmul.msk.f32.gmra.mxu3 %vm2876_vm15, %v1399_v6  ;;  %v1507_v28 = vadd.f32 %v1506_v43, %v1475_v17 }
 0x21a   : > { %v1539_v57 = vadd.f32 %v1538_v25, %v1507_v28 }
 0x21c   : > { %1553 = vst.msk [vmem:[%s2797_s8] sm:$0xff] %vm2877_vm6, %v1539_v57 }
 0x229   : > { %v1445_v1 = vpop.f32.mrf.mxu0  ;;  %v1477_v59 = vpop.f32.mrf.mxu1 }
 0x22a   : > { %v1446_v45 = vadd.f32 %v1794_v2, %v1445_v1 }
 0x22c   : > { %v1478_v24 = vadd.f32 %v1477_v59, %v1446_v45 }
 0x230   : > { %v1509_v39 = vpop.f32.mrf.mxu2  ;;  %v1541_v49 = vpop.f32.mrf.mxu3 }
 0x231   : > { %v1510_v47 = vadd.f32 %v1509_v39, %v1478_v24 }
 0x233   : > { %v1542_v51 = vadd.f32 %v1541_v49, %v1510_v47 }
 0x235   : > { %1554 = vst.msk [vmem:[%s2797_s8 + $0x8] sm:$0xff] %vm2878_vm7, %v1542_v51 }
 0x252   : > { %v1448_v53 = vpop.f32.mrf.mxu0  ;;  %v1480_v58 = vpop.f32.mrf.mxu1 }
 0x253   : > { %v1449_v8 = vadd.f32 %v1794_v2, %v1448_v53 }
 0x255   : > { %v1481_v60 = vadd.f32 %v1480_v58, %v1449_v8 }
 0x259   : > { %v1512_v44 = vpop.f32.mrf.mxu2  ;;  %v1544_v61 = vpop.f32.mrf.mxu3 }
 0x25a   : > { %v1513_v3 = vadd.f32 %v1512_v44, %v1481_v60 }
 0x25c   : > { %v1545_v27 = vadd.f32 %v1544_v61, %v1513_v3 }
 0x25e   : > { %1555 = vst.msk [vmem:[%s2797_s8 + $0x10] sm:$0xff] %vm2879_vm8, %v1545_v27 }
 0x28c   : > { %v1451_v63 = vpop.f32.mrf.mxu0  ;;  %v1483_v23 = vpop.f32.mrf.mxu1 }
 0x28d   : > { %v1452_v48 = vadd.f32 %v1794_v2, %v1451_v63 }
 0x28f   : > { %v1484_v34 = vadd.f32 %v1483_v23, %v1452_v48 }
 0x293   : > { %v1515_v5 = vpop.f32.mrf.mxu2  ;;  %v1547_v10 = vpop.f32.mrf.mxu3 }
 0x294   : > { %v1516_v11 = vadd.f32 %v1515_v5, %v1484_v34  ;;  %v1454_v0 = vpop.f32.mrf.mxu0  ;;  %v1486_v13 = vpop.f32.mrf.mxu1 }
 0x295   : > { %v1455_v12 = vadd.f32 %v1794_v2, %v1454_v0 }
 0x296   : > { %v1548_v41 = vadd.f32 %v1547_v10, %v1516_v11 }
 0x297   : > { %v1487_v40 = vadd.f32 %v1486_v13, %v1455_v12 }
 0x298   : > { %1556 = vst.msk [vmem:[%s2797_s8 + $0x18] sm:$0xff] %vm2880_vm9, %v1548_v41 }
 0x29b   : > { %v1518_v54 = vpop.f32.mrf.mxu2  ;;  %v1550_v7 = vpop.f32.mrf.mxu3 }
 0x29c   : > { %v1519_v18 = vadd.f32 %v1518_v54, %v1487_v40 }
 0x29e   : > { %v1551_v19 = vadd.f32 %v1550_v7, %v1519_v18 }
 0x2a0   : > { %1558 = vst.msk [vmem:[%s2797_s8 + $0x20] sm:$0xf] %vm1557_vm0, %v1551_v19 }
 0x2a1 PF: > { %s13_s12 = sadd.s32 1, %s1801_s12  }
 0x2a2   : > { %p10_p4 = scmp.ge.s32.totalorder %s13_s12, 4  }
 0x2a4   :  { %12 = sbr.rel (!%p10_p4) target bundleno = 1 (0x1), region = 75 }

</bundles_post_ra>
